<compile_context>
chip_gen: v6e
topology: v6e:2x2x1
jax: 0.10.0
libtpu: 0.0.40
codegen_flags: <defaults>
</compile_context>

<pallas_src>
import math

import jax
import jax.numpy as jnp
from jax.experimental import pallas as pl
from jax.experimental.pallas import tpu as pltpu


def _round_up(x, m):
    return ((x + m - 1) // m) * m


def _tile_f32_bytes(shape, bufs=1):
    """VMEM bytes for an f32 buffer of `shape`, padded to (8, 128) tiling."""
    dims = list(shape)
    dims[-1] = _round_up(dims[-1], 128)
    if len(dims) >= 2:
        dims[-2] = _round_up(dims[-2], 8)
    return bufs * 4 * math.prod(dims)


def _vmem_estimate(B, Cin, Cp1, Cmid, Cpm, Cout, K, S, G):
    scratch = (_tile_f32_bytes((B * Cp1, S + 2 * G))
               + _tile_f32_bytes((K * K * Cp1, B * S))
               + _tile_f32_bytes((B * Cpm, S + 2 * G))
               + _tile_f32_bytes((K * K * Cpm, B * S)))
    blocks = (_tile_f32_bytes((B, Cin, S), bufs=2)         # double-buffered
              + _tile_f32_bytes((Cmid, K * K * Cp1), bufs=2)
              + _tile_f32_bytes((Cmid, 1), bufs=2)
              + _tile_f32_bytes((Cout, K * K * Cpm), bufs=2)
              + _tile_f32_bytes((Cout, 1), bufs=2)
              + _tile_f32_bytes((B, Cout, S), bufs=2))
    return scratch + blocks


def _make_fused_kernel(H, W, K, B, Cin, Cp1, Cmid, Cpm, Cout):
    """Fused (conv + bias + ReLU) x2 kernel for static shapes."""
    S = H * W          # flat spatial size -> lane axis of matmuls / stores
    p = K // 2         # 'same' padding
    G = p * (W + 1)    # guard band so every tap slice stays in-bounds

    def kernel(x_ref, w1_ref, b1_ref, w2_ref, b2_ref, o_ref,
               xg_ref, pat1_ref, midg_ref, pat2_ref):
        # x_ref   : (B, Cin, S)         flat NCHW input, B images per grid step
        # w1_ref  : (Cmid, K*K*Cp1)     b1_ref: (Cmid, 1)
        # w2_ref  : (Cout, K*K*Cpm)     b2_ref: (Cout, 1)
        # o_ref   : (B, Cout, S)
        # xg_ref  : (B*Cp1, S + 2G)     guarded flat input (channel-padded)
        # pat1_ref: (K*K*Cp1, B*S)      im2col patches for conv1
        # midg_ref: (B*Cpm, S + 2G)     guarded conv1 activation
        # pat2_ref: (K*K*Cpm, B*S)      im2col patches for conv2

        # Width-boundary masks: only dw != 0 taps need them (horizontal wrap
        # would otherwise read valid pixels from the adjacent row).  Vertical
        # out-of-image reads always land in the zeroed guard bands, so dw == 0
        # taps (incl. the center tap) are stored unmasked.  The mask depends
        # only on dw -> computed once, reused for every kh and both convs.
        lane = jax.lax.broadcasted_iota(jnp.int32, (1, S), 1)
        w_idx = lane % W
        wmasks = {dw: (w_idx + dw >= 0) & (w_idx + dw < W)
                  for dw in range(-p, p + 1) if dw != 0}

        def clear_guards_and_pad_rows(g_ref, rows, C, Cp):
            # Only the 2*G guard columns (and zero-padded channel rows) are
            # cleared; the S interior columns of the real channels are fully
            # overwritten every step, so no full-buffer re-zeroing.
            g_ref[:, pl.ds(0, G)] = jnp.zeros((rows, G), jnp.float32)
            g_ref[:, pl.ds(G + S, G)] = jnp.zeros((rows, G), jnp.float32)
            if Cp > C:
                for b in range(B):
                    g_ref[pl.ds(b * Cp + C, Cp - C), :] = jnp.zeros(
                        (Cp - C, S + 2 * G), jnp.float32)

        def build_patches(src_ref, pat_ref, Cp):
            # pat[t*Cp:(t+1)*Cp, b*S:(b+1)*S] = lane-shifted view of image b
            # for tap t = kh*K + kw.  Cp % 8 == 0 -> aligned 8-row stores.
            for b in range(B):
                r0 = b * Cp
                c0 = b * S
                for kh in range(K):
                    dh = kh - p
                    for kw in range(K):
                        dw = kw - p
                        t = kh * K + kw
                        # TODO(synk): G + dh*W + dw is generally not a multiple
                        # of 128; if vld/XLU saturates on v6e/v7x, retile so the
                        # lane shift becomes a pltpu.roll on 128-wide tiles.
                        shifted = src_ref[pl.ds(r0, Cp),
                                          pl.ds(G + dh * W + dw, S)]
                        if dw != 0:
                            shifted = jnp.where(wmasks[dw], shifted, 0.0)
                        pat_ref[pl.ds(t * Cp, Cp), pl.ds(c0, S)] = shifted

        # ---- stage input into guarded scratch -------------------------------
        clear_guards_and_pad_rows(xg_ref, B * Cp1, Cin, Cp1)
        for b in range(B):
            xg_ref[pl.ds(b * Cp1, Cin), pl.ds(G, S)] = x_ref[b]

        # ---- conv1: midg <- relu(W1 @ im2col(x) + b1), all in VMEM ----------
        build_patches(xg_ref, pat1_ref, Cp1)
        y1 = jnp.dot(w1_ref[...], pat1_ref[...],
                     preferred_element_type=jnp.float32)       # (Cmid, B*S)
        clear_guards_and_pad_rows(midg_ref, B * Cpm, Cmid, Cpm)
        for b in range(B):
            # Bias + ReLU fused into the guarded-scratch store.
            midg_ref[pl.ds(b * Cpm, Cmid), pl.ds(G, S)] = jnp.maximum(
                y1[:, b * S:(b + 1) * S] + b1_ref[...], 0.0)

        # ---- conv2: out <- relu(W2 @ im2col(y1) + b2) ------------------------
        build_patches(midg_ref, pat2_ref, Cpm)
        y2 = jnp.dot(w2_ref[...], pat2_ref[...],
                     preferred_element_type=jnp.float32)       # (Cout, B*S)
        for b in range(B):
            # Lane-dense store: S is a multiple of 128 at these shapes.
            o_ref[b] = jnp.maximum(
                y2[:, b * S:(b + 1) * S] + b2_ref[...], 0.0).astype(o_ref.dtype)

    return kernel


def unet_conv_block_forward(x_nchw, w1_flat, b1, w2_flat, b2, kernel_size):
    """x_nchw: (N, Cin, H, W) f32 -> (N, Cout, H, W) f32 (conv+ReLU twice)."""
    N, Cin, H, W = x_nchw.shape
    K = kernel_size
    assert K % 2 == 1, "UNetConvBlock Pallas kernel supports odd kernel_size only"
    Cmid = w1_flat.shape[0]
    Cout = w2_flat.shape[0]
    Cp1 = w1_flat.shape[1] // (K * K)     # channel-padded Cin (mult of 8)
    Cpm = w2_flat.shape[1] // (K * K)     # channel-padded Cmid (mult of 8)
    assert Cp1 % 8 == 0 and Cp1 >= Cin
    assert Cpm % 8 == 0 and Cpm >= Cmid
    S = H * W
    p = K // 2
    G = p * (W + 1)

    # Images per grid step: largest divisor of N whose scratch + double-
    # buffered block footprint stays v7x-safe (<= ~48 MiB of 64 MiB VMEM/TC).
    budget = 48 * 1024 * 1024
    B = 1
    for cand in range(min(N, 8), 0, -1):
        if N % cand == 0 and _vmem_estimate(
                cand, Cin, Cp1, Cmid, Cpm, Cout, K, S, G) <= budget:
            B = cand
            break
    # TODO(synk): for production UNet sizes add a spatial row-tile grid axis
    # with halo rows (S_tile a multiple of 128), and for C >= ~128 switch to
    # per-tap accumulation (acc += W_tap @ shifted) instead of materializing
    # the (K*K*C, S) patch scratch.

    x_flat = x_nchw.reshape(N, Cin, S).astype(jnp.float32)   # free reshape
    b1c = b1.reshape(Cmid, 1).astype(jnp.float32)
    b2c = b2.reshape(Cout, 1).astype(jnp.float32)

    kernel = _make_fused_kernel(H, W, K, B, Cin, Cp1, Cmid, Cpm, Cout)

    est = _vmem_estimate(B, Cin, Cp1, Cmid, Cpm, Cout, K, S, G)
    vmem_limit = min(128 * 1024 * 1024, max(32 * 1024 * 1024, est + 16 * 1024 * 1024))

    out_flat = pl.pallas_call(
        kernel,
        out_shape=jax.ShapeDtypeStruct((N, Cout, S), jnp.float32),
        grid_spec=pltpu.PrefetchScalarGridSpec(
            num_scalar_prefetch=0,
            grid=(N // B,),
            in_specs=[
                pl.BlockSpec((B, Cin, S), lambda n: (n, 0, 0)),
                pl.BlockSpec((Cmid, K * K * Cp1), lambda n: (0, 0)),
                pl.BlockSpec((Cmid, 1), lambda n: (0, 0)),
                pl.BlockSpec((Cout, K * K * Cpm), lambda n: (0, 0)),
                pl.BlockSpec((Cout, 1), lambda n: (0, 0)),
            ],
            out_specs=pl.BlockSpec((B, Cout, S), lambda n: (n, 0, 0)),
            scratch_shapes=[
                pltpu.VMEM((B * Cp1, S + 2 * G), jnp.float32),
                pltpu.VMEM((K * K * Cp1, B * S), jnp.float32),
                pltpu.VMEM((B * Cpm, S + 2 * G), jnp.float32),
                pltpu.VMEM((K * K * Cpm, B * S), jnp.float32),
            ],
        ),
        compiler_params=pltpu.CompilerParams(
            dimension_semantics=("parallel",),
            vmem_limit_bytes=vmem_limit,
        ),
    )(x_flat, w1_flat, b1c, w2_flat, b2c)

    return out_flat.reshape(N, Cout, H, W)   # free reshape (contiguous split)


class UNetConvBlockPallas:
    """Mirror of the PyTorch UNetConvBlock forward (activation = ReLU)."""

    def __init__(self, in_size, out_size, kernel_size=3, key=None):
        assert kernel_size % 2 == 1, "only odd kernel_size supported (same pad)"
        if key is None:
            key = jax.random.PRNGKey(0)
        k1, k2, k3, k4 = jax.random.split(key, 4)
        K = kernel_size
        fan_in1 = in_size * K * K
        fan_in2 = out_size * K * K
        bound1 = 1.0 / math.sqrt(fan_in1)
        bound2 = 1.0 / math.sqrt(fan_in2)
        # PyTorch layout (Cout, Cin, Kh, Kw), kept for the reference path.
        self.w1 = jax.random.uniform(k1, (out_size, in_size, K, K), jnp.float32,
                                     -bound1, bound1)
        self.b1 = jax.random.uniform(k2, (out_size,), jnp.float32, -bound1, bound1)
        self.w2 = jax.random.uniform(k3, (out_size, out_size, K, K), jnp.float32,
                                     -bound2, bound2)
        self.b2 = jax.random.uniform(k4, (out_size,), jnp.float32, -bound2, bound2)
        self.kernel_size = K

        # Kernel weight layout: (Cout, K*K*Cpad), tap-major / channel-minor,
        # with input channels zero-padded to a multiple of 8 so every im2col
        # patch-row block is an aligned 8-sublane store and the contraction
        # depth K*K*Cpad is sublane-aligned.  Matches the patch stacking order
        # inside the kernel.
        # TODO(synk): store weights/activations in bf16 (f32 accumulation) to
        # halve HBM/VMEM traffic on v6e/v7x; kept f32 here for a tight check.
        Cp1 = _round_up(in_size, 8)
        Cpm = _round_up(out_size, 8)
        w1p = jnp.zeros((out_size, Cp1, K, K), jnp.float32).at[:, :in_size].set(self.w1)
        w2p = jnp.zeros((out_size, Cpm, K, K), jnp.float32).at[:, :out_size].set(self.w2)
        self.w1_flat = jnp.transpose(w1p, (0, 2, 3, 1)).reshape(out_size, K * K * Cp1)
        self.w2_flat = jnp.transpose(w2p, (0, 2, 3, 1)).reshape(out_size, K * K * Cpm)

    def __call__(self, x_nchw):
        return unet_conv_block_forward(
            x_nchw, self.w1_flat, self.b1, self.w2_flat, self.b2,
            self.kernel_size)


def _reference(x_nchw, block):
    """Pure-JAX reference using lax.conv_general_dilated."""
    K = block.kernel_size
    pad = K // 2

    def conv(x, w_oihw, b):
        y = jax.lax.conv_general_dilated(
            x, w_oihw, window_strides=(1, 1),
            padding=((pad, pad), (pad, pad)),
            dimension_numbers=("NCHW", "OIHW", "NCHW"))
        return jnp.maximum(y + b[None, :, None, None], 0.0)

    out = conv(x_nchw, block.w1, block.b1)
    out = conv(out, block.w2, block.b2)
    return out


if __name__ == "__main__":
    key = jax.random.PRNGKey(0)
    k_x, k_p = jax.random.split(key)

    N, Cin, H, W = 2, 4, 16, 16
    Cout = 8
    x = jax.random.normal(k_x, (N, Cin, H, W), dtype=jnp.float32)

    block = UNetConvBlockPallas(Cin, Cout, kernel_size=3, key=k_p)

    out = jax.block_until_ready(block(x))
    ref = jax.block_until_ready(_reference(x, block))

    assert out.shape == (N, Cout, H, W)
    assert jnp.allclose(out, ref, atol=1e-3, rtol=1e-3), "mismatch vs reference"

    print("KERNEL_OK")
</pallas_src>

<mosaic_0001>
module attributes {stable_mosaic.version = 11 : i64} {
  func.func @kernel(%arg0: i32, %arg1: memref<2x4x256xf32, #tpu.memory_space<vmem>>, %arg2: memref<8x72xf32, #tpu.memory_space<vmem>>, %arg3: memref<8x1xf32, #tpu.memory_space<vmem>>, %arg4: memref<8x72xf32, #tpu.memory_space<vmem>>, %arg5: memref<8x1xf32, #tpu.memory_space<vmem>>, %arg6: memref<2x8x256xf32, #tpu.memory_space<vmem>>, %arg7: memref<16x290xf32, #tpu.memory_space<vmem>>, %arg8: memref<72x512xf32, #tpu.memory_space<vmem>>, %arg9: memref<16x290xf32, #tpu.memory_space<vmem>>, %arg10: memref<72x512xf32, #tpu.memory_space<vmem>>) attributes {dimension_semantics = [#tpu.dimension_semantics<parallel>], iteration_bounds = array<i64: 1>, scalar_prefetch = 0 : i64, scratch_operands = 4 : i64, tpu.core_type = #tpu.core_type<tc>, window_params = [{transform_indices = @transform_0, window_bounds = array<i64: 2, 4, 256>}, {pipeline_mode = #tpu.pipeline_mode<synchronous>, transform_indices = @transform_1, window_bounds = array<i64: 8, 72>}, {pipeline_mode = #tpu.pipeline_mode<synchronous>, transform_indices = @transform_2, window_bounds = array<i64: 8, 1>}, {pipeline_mode = #tpu.pipeline_mode<synchronous>, transform_indices = @transform_3, window_bounds = array<i64: 8, 72>}, {pipeline_mode = #tpu.pipeline_mode<synchronous>, transform_indices = @transform_4, window_bounds = array<i64: 8, 1>}, {transform_indices = @transform_5, window_bounds = array<i64: 2, 8, 256>}]} {
    %0 = tpu.iota {dimensions = array<i32: 1>} : vector<1x256xi32>
    %c16_i32 = arith.constant 16 : i32
    %c0_i32 = arith.constant 0 : i32
    %1 = arith.cmpi eq, %c16_i32, %c0_i32 : i32
    %c1_i32 = arith.constant 1 : i32
    %2 = arith.select %1, %c1_i32, %c16_i32 : i32
    %3 = vector.broadcast %2 : i32 to vector<1x256xi32>
    %4 = arith.remsi %0, %3 : vector<1x256xi32>
    %c0_i32_0 = arith.constant 0 : i32
    %5 = vector.broadcast %c0_i32_0 : i32 to vector<1x256xi32>
    %6 = arith.cmpi ne, %4, %5 : vector<1x256xi32>
    %c0_i32_1 = arith.constant 0 : i32
    %7 = vector.broadcast %c0_i32_1 : i32 to vector<1x256xi32>
    %8 = arith.cmpi slt, %4, %7 : vector<1x256xi32>
    %c0_i32_2 = arith.constant 0 : i32
    %9 = arith.cmpi slt, %2, %c0_i32_2 : i32
    %10 = vector.broadcast %9 : i1 to vector<1x256xi1>
    %11 = vector.broadcast %10 : vector<1x256xi1> to vector<1x256xi1>
    %12 = arith.xori %8, %11 : vector<1x256xi1>
    %13 = arith.andi %12, %6 : vector<1x256xi1>
    %14 = vector.broadcast %2 : i32 to vector<1x256xi32>
    %15 = arith.addi %4, %14 : vector<1x256xi32>
    %16 = arith.select %13, %15, %4 : vector<1x256xi1>, vector<1x256xi32>
    %c-1_i32 = arith.constant -1 : i32
    %17 = vector.broadcast %c-1_i32 : i32 to vector<1x256xi32>
    %18 = arith.addi %16, %17 : vector<1x256xi32>
    %c0_i32_3 = arith.constant 0 : i32
    %19 = vector.broadcast %c0_i32_3 : i32 to vector<1x256xi32>
    %20 = arith.cmpi sge, %18, %19 : vector<1x256xi32>
    %c-1_i32_4 = arith.constant -1 : i32
    %21 = vector.broadcast %c-1_i32_4 : i32 to vector<1x256xi32>
    %22 = arith.addi %16, %21 : vector<1x256xi32>
    %c16_i32_5 = arith.constant 16 : i32
    %23 = vector.broadcast %c16_i32_5 : i32 to vector<1x256xi32>
    %24 = arith.cmpi slt, %22, %23 : vector<1x256xi32>
    %25 = arith.andi %20, %24 : vector<1x256xi1>
    %c1_i32_6 = arith.constant 1 : i32
    %26 = vector.broadcast %c1_i32_6 : i32 to vector<1x256xi32>
    %27 = arith.addi %16, %26 : vector<1x256xi32>
    %c0_i32_7 = arith.constant 0 : i32
    %28 = vector.broadcast %c0_i32_7 : i32 to vector<1x256xi32>
    %29 = arith.cmpi sge, %27, %28 : vector<1x256xi32>
    %c1_i32_8 = arith.constant 1 : i32
    %30 = vector.broadcast %c1_i32_8 : i32 to vector<1x256xi32>
    %31 = arith.addi %16, %30 : vector<1x256xi32>
    %c16_i32_9 = arith.constant 16 : i32
    %32 = vector.broadcast %c16_i32_9 : i32 to vector<1x256xi32>
    %33 = arith.cmpi slt, %31, %32 : vector<1x256xi32>
    %34 = arith.andi %29, %33 : vector<1x256xi1>
    %cst = arith.constant 0.000000e+00 : f32
    %35 = vector.broadcast %cst : f32 to vector<16x17xf32>
    %c0 = arith.constant 0 : index
    %c0_10 = arith.constant 0 : index
    %36 = vector.load %arg7[%c0, %c0_10] : memref<16x290xf32, #tpu.memory_space<vmem>>, vector<16x17xf32>
    tpu.vector_store %arg7[%c0, %c0_10], %35 {strides = array<i32>} : memref<16x290xf32, #tpu.memory_space<vmem>>, vector<16x17xf32>,
    %cst_11 = arith.constant 0.000000e+00 : f32
    %37 = vector.broadcast %cst_11 : f32 to vector<16x17xf32>
    %c0_12 = arith.constant 0 : index
    %c273 = arith.constant 273 : index
    %38 = vector.load %arg7[%c0_12, %c273] : memref<16x290xf32, #tpu.memory_space<vmem>>, vector<16x17xf32>
    tpu.vector_store %arg7[%c0_12, %c273], %37 {strides = array<i32>} : memref<16x290xf32, #tpu.memory_space<vmem>>, vector<16x17xf32>,
    %cst_13 = arith.constant 0.000000e+00 : f32
    %39 = vector.broadcast %cst_13 : f32 to vector<4x290xf32>
    %c4 = arith.constant 4 : index
    %c0_14 = arith.constant 0 : index
    %40 = vector.load %arg7[%c4, %c0_14] : memref<16x290xf32, #tpu.memory_space<vmem>>, vector<4x290xf32>
    tpu.vector_store %arg7[%c4, %c0_14], %39 {strides = array<i32>} : memref<16x290xf32, #tpu.memory_space<vmem>>, vector<4x290xf32>,
    %cst_15 = arith.constant 0.000000e+00 : f32
    %41 = vector.broadcast %cst_15 : f32 to vector<4x290xf32>
    %c12 = arith.constant 12 : index
    %c0_16 = arith.constant 0 : index
    %42 = vector.load %arg7[%c12, %c0_16] : memref<16x290xf32, #tpu.memory_space<vmem>>, vector<4x290xf32>
    tpu.vector_store %arg7[%c12, %c0_16], %41 {strides = array<i32>} : memref<16x290xf32, #tpu.memory_space<vmem>>, vector<4x290xf32>,
    %c0_17 = arith.constant 0 : index
    %c0_18 = arith.constant 0 : index
    %c0_19 = arith.constant 0 : index
    %43 = vector.load %arg1[%c0_17, %c0_18, %c0_19] : memref<2x4x256xf32, #tpu.memory_space<vmem>>, vector<1x4x256xf32>
    %44 = vector.shape_cast %43 : vector<1x4x256xf32> to vector<4x256xf32>
    %c0_20 = arith.constant 0 : index
    %c17 = arith.constant 17 : index
    %45 = vector.load %arg7[%c0_20, %c17] : memref<16x290xf32, #tpu.memory_space<vmem>>, vector<4x256xf32>
    tpu.vector_store %arg7[%c0_20, %c17], %44 {strides = array<i32>} : memref<16x290xf32, #tpu.memory_space<vmem>>, vector<4x256xf32>,
    %c1 = arith.constant 1 : index
    %c0_21 = arith.constant 0 : index
    %c0_22 = arith.constant 0 : index
    %46 = vector.load %arg1[%c1, %c0_21, %c0_22] : memref<2x4x256xf32, #tpu.memory_space<vmem>>, vector<1x4x256xf32>
    %47 = vector.shape_cast %46 : vector<1x4x256xf32> to vector<4x256xf32>
    %c8 = arith.constant 8 : index
    %c17_23 = arith.constant 17 : index
    %48 = vector.load %arg7[%c8, %c17_23] : memref<16x290xf32, #tpu.memory_space<vmem>>, vector<4x256xf32>
    tpu.vector_store %arg7[%c8, %c17_23], %47 {strides = array<i32>} : memref<16x290xf32, #tpu.memory_space<vmem>>, vector<4x256xf32>,
    %c0_24 = arith.constant 0 : index
    %c0_25 = arith.constant 0 : index
    %49 = vector.load %arg7[%c0_24, %c0_25] : memref<16x290xf32, #tpu.memory_space<vmem>>, vector<8x256xf32>
    %cst_26 = arith.constant 0.000000e+00 : f32
    %50 = vector.shape_cast %25 : vector<1x256xi1> to vector<1x256xi1>
    %51 = vector.broadcast %50 : vector<1x256xi1> to vector<8x256xi1>
    %52 = vector.broadcast %cst_26 : f32 to vector<8x256xf32>
    %53 = arith.select %51, %49, %52 : vector<8x256xi1>, vector<8x256xf32>
    %c0_27 = arith.constant 0 : index
    %c0_28 = arith.constant 0 : index
    %54 = vector.load %arg8[%c0_27, %c0_28] : memref<72x512xf32, #tpu.memory_space<vmem>>, vector<8x256xf32>
    tpu.vector_store %arg8[%c0_27, %c0_28], %53 {strides = array<i32>} : memref<72x512xf32, #tpu.memory_space<vmem>>, vector<8x256xf32>,
    %c0_29 = arith.constant 0 : index
    %c1_30 = arith.constant 1 : index
    %55 = vector.load %arg7[%c0_29, %c1_30] : memref<16x290xf32, #tpu.memory_space<vmem>>, vector<8x256xf32>
    %c8_31 = arith.constant 8 : index
    %c0_32 = arith.constant 0 : index
    %56 = vector.load %arg8[%c8_31, %c0_32] : memref<72x512xf32, #tpu.memory_space<vmem>>, vector<8x256xf32>
    tpu.vector_store %arg8[%c8_31, %c0_32], %55 {strides = array<i32>} : memref<72x512xf32, #tpu.memory_space<vmem>>, vector<8x256xf32>,
    %c0_33 = arith.constant 0 : index
    %c2 = arith.constant 2 : index
    %57 = vector.load %arg7[%c0_33, %c2] : memref<16x290xf32, #tpu.memory_space<vmem>>, vector<8x256xf32>
    %cst_34 = arith.constant 0.000000e+00 : f32
    %58 = vector.shape_cast %34 : vector<1x256xi1> to vector<1x256xi1>
    %59 = vector.broadcast %58 : vector<1x256xi1> to vector<8x256xi1>
    %60 = vector.broadcast %cst_34 : f32 to vector<8x256xf32>
    %61 = arith.select %59, %57, %60 : vector<8x256xi1>, vector<8x256xf32>
    %c16 = arith.constant 16 : index
    %c0_35 = arith.constant 0 : index
    %62 = vector.load %arg8[%c16, %c0_35] : memref<72x512xf32, #tpu.memory_space<vmem>>, vector<8x256xf32>
    tpu.vector_store %arg8[%c16, %c0_35], %61 {strides = array<i32>} : memref<72x512xf32, #tpu.memory_space<vmem>>, vector<8x256xf32>,
    %c0_36 = arith.constant 0 : index
    %c16_37 = arith.constant 16 : index
    %63 = vector.load %arg7[%c0_36, %c16_37] : memref<16x290xf32, #tpu.memory_space<vmem>>, vector<8x256xf32>
    %cst_38 = arith.constant 0.000000e+00 : f32
    %64 = vector.shape_cast %25 : vector<1x256xi1> to vector<1x256xi1>
    %65 = vector.broadcast %64 : vector<1x256xi1> to vector<8x256xi1>
    %66 = vector.broadcast %cst_38 : f32 to vector<8x256xf32>
    %67 = arith.select %65, %63, %66 : vector<8x256xi1>, vector<8x256xf32>
    %c24 = arith.constant 24 : index
    %c0_39 = arith.constant 0 : index
    %68 = vector.load %arg8[%c24, %c0_39] : memref<72x512xf32, #tpu.memory_space<vmem>>, vector<8x256xf32>
    tpu.vector_store %arg8[%c24, %c0_39], %67 {strides = array<i32>} : memref<72x512xf32, #tpu.memory_space<vmem>>, vector<8x256xf32>,
    %c0_40 = arith.constant 0 : index
    %c17_41 = arith.constant 17 : index
    %69 = vector.load %arg7[%c0_40, %c17_41] : memref<16x290xf32, #tpu.memory_space<vmem>>, vector<8x256xf32>
    %c32 = arith.constant 32 : index
    %c0_42 = arith.constant 0 : index
    %70 = vector.load %arg8[%c32, %c0_42] : memref<72x512xf32, #tpu.memory_space<vmem>>, vector<8x256xf32>
    tpu.vector_store %arg8[%c32, %c0_42], %69 {strides = array<i32>} : memref<72x512xf32, #tpu.memory_space<vmem>>, vector<8x256xf32>,
    %c0_43 = arith.constant 0 : index
    %c18 = arith.constant 18 : index
    %71 = vector.load %arg7[%c0_43, %c18] : memref<16x290xf32, #tpu.memory_space<vmem>>, vector<8x256xf32>
    %cst_44 = arith.constant 0.000000e+00 : f32
    %72 = vector.shape_cast %34 : vector<1x256xi1> to vector<1x256xi1>
    %73 = vector.broadcast %72 : vector<1x256xi1> to vector<8x256xi1>
    %74 = vector.broadcast %cst_44 : f32 to vector<8x256xf32>
    %75 = arith.select %73, %71, %74 : vector<8x256xi1>, vector<8x256xf32>
    %c40 = arith.constant 40 : index
    %c0_45 = arith.constant 0 : index
    %76 = vector.load %arg8[%c40, %c0_45] : memref<72x512xf32, #tpu.memory_space<vmem>>, vector<8x256xf32>
    tpu.vector_store %arg8[%c40, %c0_45], %75 {strides = array<i32>} : memref<72x512xf32, #tpu.memory_space<vmem>>, vector<8x256xf32>,
    %c0_46 = arith.constant 0 : index
    %c32_47 = arith.constant 32 : index
    %77 = vector.load %arg7[%c0_46, %c32_47] : memref<16x290xf32, #tpu.memory_space<vmem>>, vector<8x256xf32>
    %cst_48 = arith.constant 0.000000e+00 : f32
    %78 = vector.shape_cast %25 : vector<1x256xi1> to vector<1x256xi1>
    %79 = vector.broadcast %78 : vector<1x256xi1> to vector<8x256xi1>
    %80 = vector.broadcast %cst_48 : f32 to vector<8x256xf32>
    %81 = arith.select %79, %77, %80 : vector<8x256xi1>, vector<8x256xf32>
    %c48 = arith.constant 48 : index
    %c0_49 = arith.constant 0 : index
    %82 = vector.load %arg8[%c48, %c0_49] : memref<72x512xf32, #tpu.memory_space<vmem>>, vector<8x256xf32>
    tpu.vector_store %arg8[%c48, %c0_49], %81 {strides = array<i32>} : memref<72x512xf32, #tpu.memory_space<vmem>>, vector<8x256xf32>,
    %c0_50 = arith.constant 0 : index
    %c33 = arith.constant 33 : index
    %83 = vector.load %arg7[%c0_50, %c33] : memref<16x290xf32, #tpu.memory_space<vmem>>, vector<8x256xf32>
    %c56 = arith.constant 56 : index
    %c0_51 = arith.constant 0 : index
    %84 = vector.load %arg8[%c56, %c0_51] : memref<72x512xf32, #tpu.memory_space<vmem>>, vector<8x256xf32>
    tpu.vector_store %arg8[%c56, %c0_51], %83 {strides = array<i32>} : memref<72x512xf32, #tpu.memory_space<vmem>>, vector<8x256xf32>,
    %c0_52 = arith.constant 0 : index
    %c34 = arith.constant 34 : index
    %85 = vector.load %arg7[%c0_52, %c34] : memref<16x290xf32, #tpu.memory_space<vmem>>, vector<8x256xf32>
    %cst_53 = arith.constant 0.000000e+00 : f32
    %86 = vector.shape_cast %34 : vector<1x256xi1> to vector<1x256xi1>
    %87 = vector.broadcast %86 : vector<1x256xi1> to vector<8x256xi1>
    %88 = vector.broadcast %cst_53 : f32 to vector<8x256xf32>
    %89 = arith.select %87, %85, %88 : vector<8x256xi1>, vector<8x256xf32>
    %c64 = arith.constant 64 : index
    %c0_54 = arith.constant 0 : index
    %90 = vector.load %arg8[%c64, %c0_54] : memref<72x512xf32, #tpu.memory_space<vmem>>, vector<8x256xf32>
    tpu.vector_store %arg8[%c64, %c0_54], %89 {strides = array<i32>} : memref<72x512xf32, #tpu.memory_space<vmem>>, vector<8x256xf32>,
    %c8_55 = arith.constant 8 : index
    %c0_56 = arith.constant 0 : index
    %91 = vector.load %arg7[%c8_55, %c0_56] : memref<16x290xf32, #tpu.memory_space<vmem>>, vector<8x256xf32>
    %cst_57 = arith.constant 0.000000e+00 : f32
    %92 = vector.shape_cast %25 : vector<1x256xi1> to vector<1x256xi1>
    %93 = vector.broadcast %92 : vector<1x256xi1> to vector<8x256xi1>
    %94 = vector.broadcast %cst_57 : f32 to vector<8x256xf32>
    %95 = arith.select %93, %91, %94 : vector<8x256xi1>, vector<8x256xf32>
    %c0_58 = arith.constant 0 : index
    %c256 = arith.constant 256 : index
    %96 = vector.load %arg8[%c0_58, %c256] : memref<72x512xf32, #tpu.memory_space<vmem>>, vector<8x256xf32>
    tpu.vector_store %arg8[%c0_58, %c256], %95 {strides = array<i32>} : memref<72x512xf32, #tpu.memory_space<vmem>>, vector<8x256xf32>,
    %c8_59 = arith.constant 8 : index
    %c1_60 = arith.constant 1 : index
    %97 = vector.load %arg7[%c8_59, %c1_60] : memref<16x290xf32, #tpu.memory_space<vmem>>, vector<8x256xf32>
    %c8_61 = arith.constant 8 : index
    %c256_62 = arith.constant 256 : index
    %98 = vector.load %arg8[%c8_61, %c256_62] : memref<72x512xf32, #tpu.memory_space<vmem>>, vector<8x256xf32>
    tpu.vector_store %arg8[%c8_61, %c256_62], %97 {strides = array<i32>} : memref<72x512xf32, #tpu.memory_space<vmem>>, vector<8x256xf32>,
    %c8_63 = arith.constant 8 : index
    %c2_64 = arith.constant 2 : index
    %99 = vector.load %arg7[%c8_63, %c2_64] : memref<16x290xf32, #tpu.memory_space<vmem>>, vector<8x256xf32>
    %cst_65 = arith.constant 0.000000e+00 : f32
    %100 = vector.shape_cast %34 : vector<1x256xi1> to vector<1x256xi1>
    %101 = vector.broadcast %100 : vector<1x256xi1> to vector<8x256xi1>
    %102 = vector.broadcast %cst_65 : f32 to vector<8x256xf32>
    %103 = arith.select %101, %99, %102 : vector<8x256xi1>, vector<8x256xf32>
    %c16_66 = arith.constant 16 : index
    %c256_67 = arith.constant 256 : index
    %104 = vector.load %arg8[%c16_66, %c256_67] : memref<72x512xf32, #tpu.memory_space<vmem>>, vector<8x256xf32>
    tpu.vector_store %arg8[%c16_66, %c256_67], %103 {strides = array<i32>} : memref<72x512xf32, #tpu.memory_space<vmem>>, vector<8x256xf32>,
    %c8_68 = arith.constant 8 : index
    %c16_69 = arith.constant 16 : index
    %105 = vector.load %arg7[%c8_68, %c16_69] : memref<16x290xf32, #tpu.memory_space<vmem>>, vector<8x256xf32>
    %cst_70 = arith.constant 0.000000e+00 : f32
    %106 = vector.shape_cast %25 : vector<1x256xi1> to vector<1x256xi1>
    %107 = vector.broadcast %106 : vector<1x256xi1> to vector<8x256xi1>
    %108 = vector.broadcast %cst_70 : f32 to vector<8x256xf32>
    %109 = arith.select %107, %105, %108 : vector<8x256xi1>, vector<8x256xf32>
    %c24_71 = arith.constant 24 : index
    %c256_72 = arith.constant 256 : index
    %110 = vector.load %arg8[%c24_71, %c256_72] : memref<72x512xf32, #tpu.memory_space<vmem>>, vector<8x256xf32>
    tpu.vector_store %arg8[%c24_71, %c256_72], %109 {strides = array<i32>} : memref<72x512xf32, #tpu.memory_space<vmem>>, vector<8x256xf32>,
    %c8_73 = arith.constant 8 : index
    %c17_74 = arith.constant 17 : index
    %111 = vector.load %arg7[%c8_73, %c17_74] : memref<16x290xf32, #tpu.memory_space<vmem>>, vector<8x256xf32>
    %c32_75 = arith.constant 32 : index
    %c256_76 = arith.constant 256 : index
    %112 = vector.load %arg8[%c32_75, %c256_76] : memref<72x512xf32, #tpu.memory_space<vmem>>, vector<8x256xf32>
    tpu.vector_store %arg8[%c32_75, %c256_76], %111 {strides = array<i32>} : memref<72x512xf32, #tpu.memory_space<vmem>>, vector<8x256xf32>,
    %c8_77 = arith.constant 8 : index
    %c18_78 = arith.constant 18 : index
    %113 = vector.load %arg7[%c8_77, %c18_78] : memref<16x290xf32, #tpu.memory_space<vmem>>, vector<8x256xf32>
    %cst_79 = arith.constant 0.000000e+00 : f32
    %114 = vector.shape_cast %34 : vector<1x256xi1> to vector<1x256xi1>
    %115 = vector.broadcast %114 : vector<1x256xi1> to vector<8x256xi1>
    %116 = vector.broadcast %cst_79 : f32 to vector<8x256xf32>
    %117 = arith.select %115, %113, %116 : vector<8x256xi1>, vector<8x256xf32>
    %c40_80 = arith.constant 40 : index
    %c256_81 = arith.constant 256 : index
    %118 = vector.load %arg8[%c40_80, %c256_81] : memref<72x512xf32, #tpu.memory_space<vmem>>, vector<8x256xf32>
    tpu.vector_store %arg8[%c40_80, %c256_81], %117 {strides = array<i32>} : memref<72x512xf32, #tpu.memory_space<vmem>>, vector<8x256xf32>,
    %c8_82 = arith.constant 8 : index
    %c32_83 = arith.constant 32 : index
    %119 = vector.load %arg7[%c8_82, %c32_83] : memref<16x290xf32, #tpu.memory_space<vmem>>, vector<8x256xf32>
    %cst_84 = arith.constant 0.000000e+00 : f32
    %120 = vector.shape_cast %25 : vector<1x256xi1> to vector<1x256xi1>
    %121 = vector.broadcast %120 : vector<1x256xi1> to vector<8x256xi1>
    %122 = vector.broadcast %cst_84 : f32 to vector<8x256xf32>
    %123 = arith.select %121, %119, %122 : vector<8x256xi1>, vector<8x256xf32>
    %c48_85 = arith.constant 48 : index
    %c256_86 = arith.constant 256 : index
    %124 = vector.load %arg8[%c48_85, %c256_86] : memref<72x512xf32, #tpu.memory_space<vmem>>, vector<8x256xf32>
    tpu.vector_store %arg8[%c48_85, %c256_86], %123 {strides = array<i32>} : memref<72x512xf32, #tpu.memory_space<vmem>>, vector<8x256xf32>,
    %c8_87 = arith.constant 8 : index
    %c33_88 = arith.constant 33 : index
    %125 = vector.load %arg7[%c8_87, %c33_88] : memref<16x290xf32, #tpu.memory_space<vmem>>, vector<8x256xf32>
    %c56_89 = arith.constant 56 : index
    %c256_90 = arith.constant 256 : index
    %126 = vector.load %arg8[%c56_89, %c256_90] : memref<72x512xf32, #tpu.memory_space<vmem>>, vector<8x256xf32>
    tpu.vector_store %arg8[%c56_89, %c256_90], %125 {strides = array<i32>} : memref<72x512xf32, #tpu.memory_space<vmem>>, vector<8x256xf32>,
    %c8_91 = arith.constant 8 : index
    %c34_92 = arith.constant 34 : index
    %127 = vector.load %arg7[%c8_91, %c34_92] : memref<16x290xf32, #tpu.memory_space<vmem>>, vector<8x256xf32>
    %cst_93 = arith.constant 0.000000e+00 : f32
    %128 = vector.shape_cast %34 : vector<1x256xi1> to vector<1x256xi1>
    %129 = vector.broadcast %128 : vector<1x256xi1> to vector<8x256xi1>
    %130 = vector.broadcast %cst_93 : f32 to vector<8x256xf32>
    %131 = arith.select %129, %127, %130 : vector<8x256xi1>, vector<8x256xf32>
    %c64_94 = arith.constant 64 : index
    %c256_95 = arith.constant 256 : index
    %132 = vector.load %arg8[%c64_94, %c256_95] : memref<72x512xf32, #tpu.memory_space<vmem>>, vector<8x256xf32>
    tpu.vector_store %arg8[%c64_94, %c256_95], %131 {strides = array<i32>} : memref<72x512xf32, #tpu.memory_space<vmem>>, vector<8x256xf32>,
    %c0_96 = arith.constant 0 : index
    %c0_97 = arith.constant 0 : index
    %133 = vector.load %arg2[%c0_96, %c0_97] : memref<8x72xf32, #tpu.memory_space<vmem>>, vector<8x72xf32>
    %c0_98 = arith.constant 0 : index
    %c0_99 = arith.constant 0 : index
    %134 = vector.load %arg8[%c0_98, %c0_99] : memref<72x512xf32, #tpu.memory_space<vmem>>, vector<72x512xf32>
    %cst_100 = arith.constant dense<0.000000e+00> : vector<8x512xf32>
    %135 = tpu.matmul %133, %134, %cst_100 {dimension_numbers = #tpu.dot_dimension_numbers<[1], [0], [0], [1], [0, 0, 1, 1], [], []>} : vector<8x72xf32>, vector<72x512xf32>, vector<8x512xf32> -> vector<8x512xf32>
    %cst_101 = arith.constant 0.000000e+00 : f32
    %136 = vector.broadcast %cst_101 : f32 to vector<16x17xf32>
    %c0_102 = arith.constant 0 : index
    %c0_103 = arith.constant 0 : index
    %137 = vector.load %arg9[%c0_102, %c0_103] : memref<16x290xf32, #tpu.memory_space<vmem>>, vector<16x17xf32>
    tpu.vector_store %arg9[%c0_102, %c0_103], %136 {strides = array<i32>} : memref<16x290xf32, #tpu.memory_space<vmem>>, vector<16x17xf32>,
    %cst_104 = arith.constant 0.000000e+00 : f32
    %138 = vector.broadcast %cst_104 : f32 to vector<16x17xf32>
    %c0_105 = arith.constant 0 : index
    %c273_106 = arith.constant 273 : index
    %139 = vector.load %arg9[%c0_105, %c273_106] : memref<16x290xf32, #tpu.memory_space<vmem>>, vector<16x17xf32>
    tpu.vector_store %arg9[%c0_105, %c273_106], %138 {strides = array<i32>} : memref<16x290xf32, #tpu.memory_space<vmem>>, vector<16x17xf32>,
    %140 = vector.extract_strided_slice %135 {offsets = [0, 0], sizes = [8, 256], strides = [1, 1]} : vector<8x512xf32> to vector<8x256xf32>
    %c0_107 = arith.constant 0 : index
    %c0_108 = arith.constant 0 : index
    %141 = vector.load %arg3[%c0_107, %c0_108] : memref<8x1xf32, #tpu.memory_space<vmem>>, vector<8x1xf32>
    %142 = vector.broadcast %141 : vector<8x1xf32> to vector<8x256xf32>
    %143 = arith.addf %140, %142 : vector<8x256xf32>
    %cst_109 = arith.constant 0.000000e+00 : f32
    %144 = vector.broadcast %cst_109 : f32 to vector<8x256xf32>
    %145 = arith.maximumf %143, %144 : vector<8x256xf32>
    %c0_110 = arith.constant 0 : index
    %c17_111 = arith.constant 17 : index
    %146 = vector.load %arg9[%c0_110, %c17_111] : memref<16x290xf32, #tpu.memory_space<vmem>>, vector<8x256xf32>
    tpu.vector_store %arg9[%c0_110, %c17_111], %145 {strides = array<i32>} : memref<16x290xf32, #tpu.memory_space<vmem>>, vector<8x256xf32>,
    %147 = vector.extract_strided_slice %135 {offsets = [0, 256], sizes = [8, 256], strides = [1, 1]} : vector<8x512xf32> to vector<8x256xf32>
    %c0_112 = arith.constant 0 : index
    %c0_113 = arith.constant 0 : index
    %148 = vector.load %arg3[%c0_112, %c0_113] : memref<8x1xf32, #tpu.memory_space<vmem>>, vector<8x1xf32>
    %149 = vector.broadcast %148 : vector<8x1xf32> to vector<8x256xf32>
    %150 = arith.addf %147, %149 : vector<8x256xf32>
    %cst_114 = arith.constant 0.000000e+00 : f32
    %151 = vector.broadcast %cst_114 : f32 to vector<8x256xf32>
    %152 = arith.maximumf %150, %151 : vector<8x256xf32>
    %c8_115 = arith.constant 8 : index
    %c17_116 = arith.constant 17 : index
    %153 = vector.load %arg9[%c8_115, %c17_116] : memref<16x290xf32, #tpu.memory_space<vmem>>, vector<8x256xf32>
    tpu.vector_store %arg9[%c8_115, %c17_116], %152 {strides = array<i32>} : memref<16x290xf32, #tpu.memory_space<vmem>>, vector<8x256xf32>,
    %c0_117 = arith.constant 0 : index
    %c0_118 = arith.constant 0 : index
    %154 = vector.load %arg9[%c0_117, %c0_118] : memref<16x290xf32, #tpu.memory_space<vmem>>, vector<8x256xf32>
    %cst_119 = arith.constant 0.000000e+00 : f32
    %155 = vector.shape_cast %25 : vector<1x256xi1> to vector<1x256xi1>
    %156 = vector.broadcast %155 : vector<1x256xi1> to vector<8x256xi1>
    %157 = vector.broadcast %cst_119 : f32 to vector<8x256xf32>
    %158 = arith.select %156, %154, %157 : vector<8x256xi1>, vector<8x256xf32>
    %c0_120 = arith.constant 0 : index
    %c0_121 = arith.constant 0 : index
    %159 = vector.load %arg10[%c0_120, %c0_121] : memref<72x512xf32, #tpu.memory_space<vmem>>, vector<8x256xf32>
    tpu.vector_store %arg10[%c0_120, %c0_121], %158 {strides = array<i32>} : memref<72x512xf32, #tpu.memory_space<vmem>>, vector<8x256xf32>,
    %c0_122 = arith.constant 0 : index
    %c1_123 = arith.constant 1 : index
    %160 = vector.load %arg9[%c0_122, %c1_123] : memref<16x290xf32, #tpu.memory_space<vmem>>, vector<8x256xf32>
    %c8_124 = arith.constant 8 : index
    %c0_125 = arith.constant 0 : index
    %161 = vector.load %arg10[%c8_124, %c0_125] : memref<72x512xf32, #tpu.memory_space<vmem>>, vector<8x256xf32>
    tpu.vector_store %arg10[%c8_124, %c0_125], %160 {strides = array<i32>} : memref<72x512xf32, #tpu.memory_space<vmem>>, vector<8x256xf32>,
    %c0_126 = arith.constant 0 : index
    %c2_127 = arith.constant 2 : index
    %162 = vector.load %arg9[%c0_126, %c2_127] : memref<16x290xf32, #tpu.memory_space<vmem>>, vector<8x256xf32>
    %cst_128 = arith.constant 0.000000e+00 : f32
    %163 = vector.shape_cast %34 : vector<1x256xi1> to vector<1x256xi1>
    %164 = vector.broadcast %163 : vector<1x256xi1> to vector<8x256xi1>
    %165 = vector.broadcast %cst_128 : f32 to vector<8x256xf32>
    %166 = arith.select %164, %162, %165 : vector<8x256xi1>, vector<8x256xf32>
    %c16_129 = arith.constant 16 : index
    %c0_130 = arith.constant 0 : index
    %167 = vector.load %arg10[%c16_129, %c0_130] : memref<72x512xf32, #tpu.memory_space<vmem>>, vector<8x256xf32>
    tpu.vector_store %arg10[%c16_129, %c0_130], %166 {strides = array<i32>} : memref<72x512xf32, #tpu.memory_space<vmem>>, vector<8x256xf32>,
    %c0_131 = arith.constant 0 : index
    %c16_132 = arith.constant 16 : index
    %168 = vector.load %arg9[%c0_131, %c16_132] : memref<16x290xf32, #tpu.memory_space<vmem>>, vector<8x256xf32>
    %cst_133 = arith.constant 0.000000e+00 : f32
    %169 = vector.shape_cast %25 : vector<1x256xi1> to vector<1x256xi1>
    %170 = vector.broadcast %169 : vector<1x256xi1> to vector<8x256xi1>
    %171 = vector.broadcast %cst_133 : f32 to vector<8x256xf32>
    %172 = arith.select %170, %168, %171 : vector<8x256xi1>, vector<8x256xf32>
    %c24_134 = arith.constant 24 : index
    %c0_135 = arith.constant 0 : index
    %173 = vector.load %arg10[%c24_134, %c0_135] : memref<72x512xf32, #tpu.memory_space<vmem>>, vector<8x256xf32>
    tpu.vector_store %arg10[%c24_134, %c0_135], %172 {strides = array<i32>} : memref<72x512xf32, #tpu.memory_space<vmem>>, vector<8x256xf32>,
    %c0_136 = arith.constant 0 : index
    %c17_137 = arith.constant 17 : index
    %174 = vector.load %arg9[%c0_136, %c17_137] : memref<16x290xf32, #tpu.memory_space<vmem>>, vector<8x256xf32>
    %c32_138 = arith.constant 32 : index
    %c0_139 = arith.constant 0 : index
    %175 = vector.load %arg10[%c32_138, %c0_139] : memref<72x512xf32, #tpu.memory_space<vmem>>, vector<8x256xf32>
    tpu.vector_store %arg10[%c32_138, %c0_139], %174 {strides = array<i32>} : memref<72x512xf32, #tpu.memory_space<vmem>>, vector<8x256xf32>,
    %c0_140 = arith.constant 0 : index
    %c18_141 = arith.constant 18 : index
    %176 = vector.load %arg9[%c0_140, %c18_141] : memref<16x290xf32, #tpu.memory_space<vmem>>, vector<8x256xf32>
    %cst_142 = arith.constant 0.000000e+00 : f32
    %177 = vector.shape_cast %34 : vector<1x256xi1> to vector<1x256xi1>
    %178 = vector.broadcast %177 : vector<1x256xi1> to vector<8x256xi1>
    %179 = vector.broadcast %cst_142 : f32 to vector<8x256xf32>
    %180 = arith.select %178, %176, %179 : vector<8x256xi1>, vector<8x256xf32>
    %c40_143 = arith.constant 40 : index
    %c0_144 = arith.constant 0 : index
    %181 = vector.load %arg10[%c40_143, %c0_144] : memref<72x512xf32, #tpu.memory_space<vmem>>, vector<8x256xf32>
    tpu.vector_store %arg10[%c40_143, %c0_144], %180 {strides = array<i32>} : memref<72x512xf32, #tpu.memory_space<vmem>>, vector<8x256xf32>,
    %c0_145 = arith.constant 0 : index
    %c32_146 = arith.constant 32 : index
    %182 = vector.load %arg9[%c0_145, %c32_146] : memref<16x290xf32, #tpu.memory_space<vmem>>, vector<8x256xf32>
    %cst_147 = arith.constant 0.000000e+00 : f32
    %183 = vector.shape_cast %25 : vector<1x256xi1> to vector<1x256xi1>
    %184 = vector.broadcast %183 : vector<1x256xi1> to vector<8x256xi1>
    %185 = vector.broadcast %cst_147 : f32 to vector<8x256xf32>
    %186 = arith.select %184, %182, %185 : vector<8x256xi1>, vector<8x256xf32>
    %c48_148 = arith.constant 48 : index
    %c0_149 = arith.constant 0 : index
    %187 = vector.load %arg10[%c48_148, %c0_149] : memref<72x512xf32, #tpu.memory_space<vmem>>, vector<8x256xf32>
    tpu.vector_store %arg10[%c48_148, %c0_149], %186 {strides = array<i32>} : memref<72x512xf32, #tpu.memory_space<vmem>>, vector<8x256xf32>,
    %c0_150 = arith.constant 0 : index
    %c33_151 = arith.constant 33 : index
    %188 = vector.load %arg9[%c0_150, %c33_151] : memref<16x290xf32, #tpu.memory_space<vmem>>, vector<8x256xf32>
    %c56_152 = arith.constant 56 : index
    %c0_153 = arith.constant 0 : index
    %189 = vector.load %arg10[%c56_152, %c0_153] : memref<72x512xf32, #tpu.memory_space<vmem>>, vector<8x256xf32>
    tpu.vector_store %arg10[%c56_152, %c0_153], %188 {strides = array<i32>} : memref<72x512xf32, #tpu.memory_space<vmem>>, vector<8x256xf32>,
    %c0_154 = arith.constant 0 : index
    %c34_155 = arith.constant 34 : index
    %190 = vector.load %arg9[%c0_154, %c34_155] : memref<16x290xf32, #tpu.memory_space<vmem>>, vector<8x256xf32>
    %cst_156 = arith.constant 0.000000e+00 : f32
    %191 = vector.shape_cast %34 : vector<1x256xi1> to vector<1x256xi1>
    %192 = vector.broadcast %191 : vector<1x256xi1> to vector<8x256xi1>
    %193 = vector.broadcast %cst_156 : f32 to vector<8x256xf32>
    %194 = arith.select %192, %190, %193 : vector<8x256xi1>, vector<8x256xf32>
    %c64_157 = arith.constant 64 : index
    %c0_158 = arith.constant 0 : index
    %195 = vector.load %arg10[%c64_157, %c0_158] : memref<72x512xf32, #tpu.memory_space<vmem>>, vector<8x256xf32>
    tpu.vector_store %arg10[%c64_157, %c0_158], %194 {strides = array<i32>} : memref<72x512xf32, #tpu.memory_space<vmem>>, vector<8x256xf32>,
    %c8_159 = arith.constant 8 : index
    %c0_160 = arith.constant 0 : index
    %196 = vector.load %arg9[%c8_159, %c0_160] : memref<16x290xf32, #tpu.memory_space<vmem>>, vector<8x256xf32>
    %cst_161 = arith.constant 0.000000e+00 : f32
    %197 = vector.shape_cast %25 : vector<1x256xi1> to vector<1x256xi1>
    %198 = vector.broadcast %197 : vector<1x256xi1> to vector<8x256xi1>
    %199 = vector.broadcast %cst_161 : f32 to vector<8x256xf32>
    %200 = arith.select %198, %196, %199 : vector<8x256xi1>, vector<8x256xf32>
    %c0_162 = arith.constant 0 : index
    %c256_163 = arith.constant 256 : index
    %201 = vector.load %arg10[%c0_162, %c256_163] : memref<72x512xf32, #tpu.memory_space<vmem>>, vector<8x256xf32>
    tpu.vector_store %arg10[%c0_162, %c256_163], %200 {strides = array<i32>} : memref<72x512xf32, #tpu.memory_space<vmem>>, vector<8x256xf32>,
    %c8_164 = arith.constant 8 : index
    %c1_165 = arith.constant 1 : index
    %202 = vector.load %arg9[%c8_164, %c1_165] : memref<16x290xf32, #tpu.memory_space<vmem>>, vector<8x256xf32>
    %c8_166 = arith.constant 8 : index
    %c256_167 = arith.constant 256 : index
    %203 = vector.load %arg10[%c8_166, %c256_167] : memref<72x512xf32, #tpu.memory_space<vmem>>, vector<8x256xf32>
    tpu.vector_store %arg10[%c8_166, %c256_167], %202 {strides = array<i32>} : memref<72x512xf32, #tpu.memory_space<vmem>>, vector<8x256xf32>,
    %c8_168 = arith.constant 8 : index
    %c2_169 = arith.constant 2 : index
    %204 = vector.load %arg9[%c8_168, %c2_169] : memref<16x290xf32, #tpu.memory_space<vmem>>, vector<8x256xf32>
    %cst_170 = arith.constant 0.000000e+00 : f32
    %205 = vector.shape_cast %34 : vector<1x256xi1> to vector<1x256xi1>
    %206 = vector.broadcast %205 : vector<1x256xi1> to vector<8x256xi1>
    %207 = vector.broadcast %cst_170 : f32 to vector<8x256xf32>
    %208 = arith.select %206, %204, %207 : vector<8x256xi1>, vector<8x256xf32>
    %c16_171 = arith.constant 16 : index
    %c256_172 = arith.constant 256 : index
    %209 = vector.load %arg10[%c16_171, %c256_172] : memref<72x512xf32, #tpu.memory_space<vmem>>, vector<8x256xf32>
    tpu.vector_store %arg10[%c16_171, %c256_172], %208 {strides = array<i32>} : memref<72x512xf32, #tpu.memory_space<vmem>>, vector<8x256xf32>,
    %c8_173 = arith.constant 8 : index
    %c16_174 = arith.constant 16 : index
    %210 = vector.load %arg9[%c8_173, %c16_174] : memref<16x290xf32, #tpu.memory_space<vmem>>, vector<8x256xf32>
    %cst_175 = arith.constant 0.000000e+00 : f32
    %211 = vector.shape_cast %25 : vector<1x256xi1> to vector<1x256xi1>
    %212 = vector.broadcast %211 : vector<1x256xi1> to vector<8x256xi1>
    %213 = vector.broadcast %cst_175 : f32 to vector<8x256xf32>
    %214 = arith.select %212, %210, %213 : vector<8x256xi1>, vector<8x256xf32>
    %c24_176 = arith.constant 24 : index
    %c256_177 = arith.constant 256 : index
    %215 = vector.load %arg10[%c24_176, %c256_177] : memref<72x512xf32, #tpu.memory_space<vmem>>, vector<8x256xf32>
    tpu.vector_store %arg10[%c24_176, %c256_177], %214 {strides = array<i32>} : memref<72x512xf32, #tpu.memory_space<vmem>>, vector<8x256xf32>,
    %c8_178 = arith.constant 8 : index
    %c17_179 = arith.constant 17 : index
    %216 = vector.load %arg9[%c8_178, %c17_179] : memref<16x290xf32, #tpu.memory_space<vmem>>, vector<8x256xf32>
    %c32_180 = arith.constant 32 : index
    %c256_181 = arith.constant 256 : index
    %217 = vector.load %arg10[%c32_180, %c256_181] : memref<72x512xf32, #tpu.memory_space<vmem>>, vector<8x256xf32>
    tpu.vector_store %arg10[%c32_180, %c256_181], %216 {strides = array<i32>} : memref<72x512xf32, #tpu.memory_space<vmem>>, vector<8x256xf32>,
    %c8_182 = arith.constant 8 : index
    %c18_183 = arith.constant 18 : index
    %218 = vector.load %arg9[%c8_182, %c18_183] : memref<16x290xf32, #tpu.memory_space<vmem>>, vector<8x256xf32>
    %cst_184 = arith.constant 0.000000e+00 : f32
    %219 = vector.shape_cast %34 : vector<1x256xi1> to vector<1x256xi1>
    %220 = vector.broadcast %219 : vector<1x256xi1> to vector<8x256xi1>
    %221 = vector.broadcast %cst_184 : f32 to vector<8x256xf32>
    %222 = arith.select %220, %218, %221 : vector<8x256xi1>, vector<8x256xf32>
    %c40_185 = arith.constant 40 : index
    %c256_186 = arith.constant 256 : index
    %223 = vector.load %arg10[%c40_185, %c256_186] : memref<72x512xf32, #tpu.memory_space<vmem>>, vector<8x256xf32>
    tpu.vector_store %arg10[%c40_185, %c256_186], %222 {strides = array<i32>} : memref<72x512xf32, #tpu.memory_space<vmem>>, vector<8x256xf32>,
    %c8_187 = arith.constant 8 : index
    %c32_188 = arith.constant 32 : index
    %224 = vector.load %arg9[%c8_187, %c32_188] : memref<16x290xf32, #tpu.memory_space<vmem>>, vector<8x256xf32>
    %cst_189 = arith.constant 0.000000e+00 : f32
    %225 = vector.shape_cast %25 : vector<1x256xi1> to vector<1x256xi1>
    %226 = vector.broadcast %225 : vector<1x256xi1> to vector<8x256xi1>
    %227 = vector.broadcast %cst_189 : f32 to vector<8x256xf32>
    %228 = arith.select %226, %224, %227 : vector<8x256xi1>, vector<8x256xf32>
    %c48_190 = arith.constant 48 : index
    %c256_191 = arith.constant 256 : index
    %229 = vector.load %arg10[%c48_190, %c256_191] : memref<72x512xf32, #tpu.memory_space<vmem>>, vector<8x256xf32>
    tpu.vector_store %arg10[%c48_190, %c256_191], %228 {strides = array<i32>} : memref<72x512xf32, #tpu.memory_space<vmem>>, vector<8x256xf32>,
    %c8_192 = arith.constant 8 : index
    %c33_193 = arith.constant 33 : index
    %230 = vector.load %arg9[%c8_192, %c33_193] : memref<16x290xf32, #tpu.memory_space<vmem>>, vector<8x256xf32>
    %c56_194 = arith.constant 56 : index
    %c256_195 = arith.constant 256 : index
    %231 = vector.load %arg10[%c56_194, %c256_195] : memref<72x512xf32, #tpu.memory_space<vmem>>, vector<8x256xf32>
    tpu.vector_store %arg10[%c56_194, %c256_195], %230 {strides = array<i32>} : memref<72x512xf32, #tpu.memory_space<vmem>>, vector<8x256xf32>,
    %c8_196 = arith.constant 8 : index
    %c34_197 = arith.constant 34 : index
    %232 = vector.load %arg9[%c8_196, %c34_197] : memref<16x290xf32, #tpu.memory_space<vmem>>, vector<8x256xf32>
    %cst_198 = arith.constant 0.000000e+00 : f32
    %233 = vector.shape_cast %34 : vector<1x256xi1> to vector<1x256xi1>
    %234 = vector.broadcast %233 : vector<1x256xi1> to vector<8x256xi1>
    %235 = vector.broadcast %cst_198 : f32 to vector<8x256xf32>
    %236 = arith.select %234, %232, %235 : vector<8x256xi1>, vector<8x256xf32>
    %c64_199 = arith.constant 64 : index
    %c256_200 = arith.constant 256 : index
    %237 = vector.load %arg10[%c64_199, %c256_200] : memref<72x512xf32, #tpu.memory_space<vmem>>, vector<8x256xf32>
    tpu.vector_store %arg10[%c64_199, %c256_200], %236 {strides = array<i32>} : memref<72x512xf32, #tpu.memory_space<vmem>>, vector<8x256xf32>,
    %c0_201 = arith.constant 0 : index
    %c0_202 = arith.constant 0 : index
    %238 = vector.load %arg4[%c0_201, %c0_202] : memref<8x72xf32, #tpu.memory_space<vmem>>, vector<8x72xf32>
    %c0_203 = arith.constant 0 : index
    %c0_204 = arith.constant 0 : index
    %239 = vector.load %arg10[%c0_203, %c0_204] : memref<72x512xf32, #tpu.memory_space<vmem>>, vector<72x512xf32>
    %cst_205 = arith.constant dense<0.000000e+00> : vector<8x512xf32>
    %240 = tpu.matmul %238, %239, %cst_205 {dimension_numbers = #tpu.dot_dimension_numbers<[1], [0], [0], [1], [0, 0, 1, 1], [], []>} : vector<8x72xf32>, vector<72x512xf32>, vector<8x512xf32> -> vector<8x512xf32>
    %241 = vector.extract_strided_slice %240 {offsets = [0, 0], sizes = [8, 256], strides = [1, 1]} : vector<8x512xf32> to vector<8x256xf32>
    %c0_206 = arith.constant 0 : index
    %c0_207 = arith.constant 0 : index
    %242 = vector.load %arg5[%c0_206, %c0_207] : memref<8x1xf32, #tpu.memory_space<vmem>>, vector<8x1xf32>
    %243 = vector.broadcast %242 : vector<8x1xf32> to vector<8x256xf32>
    %244 = arith.addf %241, %243 : vector<8x256xf32>
    %cst_208 = arith.constant 0.000000e+00 : f32
    %245 = vector.broadcast %cst_208 : f32 to vector<8x256xf32>
    %246 = arith.maximumf %244, %245 : vector<8x256xf32>
    %c0_209 = arith.constant 0 : index
    %c0_210 = arith.constant 0 : index
    %c0_211 = arith.constant 0 : index
    %247 = vector.load %arg6[%c0_209, %c0_210, %c0_211] : memref<2x8x256xf32, #tpu.memory_space<vmem>>, vector<1x8x256xf32>
    %248 = vector.shape_cast %247 : vector<1x8x256xf32> to vector<8x256xf32>
    %249 = vector.shape_cast %246 : vector<8x256xf32> to vector<1x8x256xf32>
    tpu.vector_store %arg6[%c0_209, %c0_210, %c0_211], %249 {strides = array<i32>} : memref<2x8x256xf32, #tpu.memory_space<vmem>>, vector<1x8x256xf32>,
    %250 = vector.extract_strided_slice %240 {offsets = [0, 256], sizes = [8, 256], strides = [1, 1]} : vector<8x512xf32> to vector<8x256xf32>
    %c0_212 = arith.constant 0 : index
    %c0_213 = arith.constant 0 : index
    %251 = vector.load %arg5[%c0_212, %c0_213] : memref<8x1xf32, #tpu.memory_space<vmem>>, vector<8x1xf32>
    %252 = vector.broadcast %251 : vector<8x1xf32> to vector<8x256xf32>
    %253 = arith.addf %250, %252 : vector<8x256xf32>
    %cst_214 = arith.constant 0.000000e+00 : f32
    %254 = vector.broadcast %cst_214 : f32 to vector<8x256xf32>
    %255 = arith.maximumf %253, %254 : vector<8x256xf32>
    %c1_215 = arith.constant 1 : index
    %c0_216 = arith.constant 0 : index
    %c0_217 = arith.constant 0 : index
    %256 = vector.load %arg6[%c1_215, %c0_216, %c0_217] : memref<2x8x256xf32, #tpu.memory_space<vmem>>, vector<1x8x256xf32>
    %257 = vector.shape_cast %256 : vector<1x8x256xf32> to vector<8x256xf32>
    %258 = vector.shape_cast %255 : vector<8x256xf32> to vector<1x8x256xf32>
    tpu.vector_store %arg6[%c1_215, %c0_216, %c0_217], %258 {strides = array<i32>} : memref<2x8x256xf32, #tpu.memory_space<vmem>>, vector<1x8x256xf32>,
    return
  }
  func.func @transform_0(%arg0: i32) -> (i32, i32, i32) {
    %c0_i32 = arith.constant 0 : i32
    %c0_i32_0 = arith.constant 0 : i32
    %c0_i32_1 = arith.constant 0 : i32
    return %arg0, %c0_i32, %c0_i32_0 : i32, i32, i32
  }
  func.func @transform_1(%arg0: i32) -> (i32, i32) {
    %c0_i32 = arith.constant 0 : i32
    %c0_i32_0 = arith.constant 0 : i32
    %c0_i32_1 = arith.constant 0 : i32
    return %c0_i32, %c0_i32_0 : i32, i32
  }
  func.func @transform_2(%arg0: i32) -> (i32, i32) {
    %c0_i32 = arith.constant 0 : i32
    %c0_i32_0 = arith.constant 0 : i32
    %c0_i32_1 = arith.constant 0 : i32
    return %c0_i32, %c0_i32_0 : i32, i32
  }
  func.func @transform_3(%arg0: i32) -> (i32, i32) {
    %c0_i32 = arith.constant 0 : i32
    %c0_i32_0 = arith.constant 0 : i32
    %c0_i32_1 = arith.constant 0 : i32
    return %c0_i32, %c0_i32_0 : i32, i32
  }
  func.func @transform_4(%arg0: i32) -> (i32, i32) {
    %c0_i32 = arith.constant 0 : i32
    %c0_i32_0 = arith.constant 0 : i32
    %c0_i32_1 = arith.constant 0 : i32
    return %c0_i32, %c0_i32_0 : i32, i32
  }
  func.func @transform_5(%arg0: i32) -> (i32, i32, i32) {
    %c0_i32 = arith.constant 0 : i32
    %c0_i32_0 = arith.constant 0 : i32
    %c0_i32_1 = arith.constant 0 : i32
    return %arg0, %c0_i32, %c0_i32_0 : i32, i32, i32
  }
}

</mosaic_0001>

<bundles_post_ra>
// kernel: tpu_custom_call.1
= control target key start
LH: loop header
LB: loop body
LE: loop exit
PB: predicated region body
PF: predicated region fallthrough
CT: control target
= control target key end

     0   :  { %10 = vsyncpa [#allocation7], 0  ;;  %s1885_s0 = inlined_call_operand.vmem [shape: f32[2,4,256], index: 0, kind: input, shape index: {}]   ;;  %s1886_s1 = inlined_call_operand.hbm [shape: f32[8,72], index: 1, kind: input, shape index: {}]   ;;  %s1887_s2 = inlined_call_operand.vmem [shape: f32[8,1], index: 2, kind: input, shape index: {}]   ;;  %s1888_s3 = inlined_call_operand.hbm [shape: f32[8,72], index: 3, kind: input, shape index: {}]   ;;  %s1889_s4 = inlined_call_operand.vmem [shape: f32[8,1], index: 4, kind: input, shape index: {}]   ;;  %s1890_s5 = inlined_call_operand.hbm [shape: f32[2,8,256], index: 5, kind: output, shape index: {}]  }
   0x1   :  { %11 = vsyncpa [#allocation10], 0 }
   0x2   :  { %12 = vsyncpa [#allocation8], 0  ;;  %s1386_s18 = smov [#allocation6]   ;;  %s1387_s20 = smov [#allocation9]  }
   0x3   :  { %s21_s19 = sshll.u32 %s1386_s18, 4  ;;  %s33_s21 = sshll.u32 %s1387_s20, 4  ;;  %s22_s19 = int_to_ptr.vmem [resolvable:$true] %s21_s19  ;;  %s34_s21 = int_to_ptr.vmem [resolvable:$true] %s33_s21 }
   0x4   :  { %s1328_s22 = scalar_lea.vmem %s22_s19, 128  ;;  %p1333_p1 = scmp.lt.s32.totalorder %s22_s19, %s22_s19 }
   0x5   :  { %p1329_p0 = scmp.ne.s32.totalorder %s22_s19, %s1328_s22  ;;  %p1334_p2 = scmp.lt.s32.totalorder %s1328_s22, %s1328_s22 }
   0x7   :  { %p1335_p3 = por %p1334_p2, %p1333_p1 }
   0x9   :  { %p1336_p4 = pnand %p1335_p3, %p1329_p0 }
   0xb   :  { %1339 = shalt.err (!%p1336_p4)
}
   0xc   :  { %24 = dma.hbm_to_vmem [thread:$0]  %s1886_s1, 128, %s22_s19, [#allocation7]  }
   0xd   :  { %s1348_s25 = scalar_lea.vmem %s34_s21, 128  ;;  %p1353_p6 = scmp.lt.s32.totalorder %s34_s21, %s34_s21 }
   0xe   :  { %p1349_p5 = scmp.ne.s32.totalorder %s34_s21, %s1348_s25  ;;  %p1354_p7 = scmp.lt.s32.totalorder %s1348_s25, %s1348_s25 }
  0x10   :  { %p1355_p8 = por %p1354_p7, %p1353_p6 }
  0x12   :  { %p1356_p9 = pnand %p1355_p8, %p1349_p5 }
  0x14   :  { %1359 = shalt.err (!%p1356_p9)
}
  0x15   :  { %36 = dma.hbm_to_vmem [thread:$0]  %s1888_s3, 128, %s34_s21, [#allocation10]  }
  0x16   :  { %1380 = dma.done.wait [#allocation7], 128  }
  0x17   :  { %1381 = vsyncadd [#allocation7], 4294967168 }
  0x18   :  { %1382 = dma.done.wait [#allocation10], 128  }
  0x19   :  { %1383 = vsyncadd [#allocation10], 4294967168  ;;  %vm88_vm0 = vcmask 138240   ;;  %v1388_v0 = vmov 0.0   ;;  %vm91_vm1 = vcmask 277640   ;;  %vm96_vm2 = vcmask 277508  }
  0x1a   :  { %90 = vst.msk [vmem:[#allocation2 + $0x18] sm:$0xff] %vm88_vm0, %v1388_v0  ;;  %89 = vst.msk [vmem:[#allocation2] sm:$0xff] %vm88_vm0, %v1388_v0  ;;  %573 = vmatprep.mubr.f32.mxu0 %v1388_v0  ;;  %644 = vmatprep.mubr.f32.mxu1 %v1388_v0  ;;  %v1247_v1 = vld [vmem:[%s1885_s0 + $0x8] sm:$0xff]  ;;  %v101_v2 = vld [vmem:[%s1885_s0] sm:$0xff]  ;;  %s1389_s30 = smov 17   ;;  %vm112_vm3 = vcmask 1043592   ;;  %v45_v23 = vlaneseq }
  0x1b   :  { %95 = vst [vmem:[#allocation2 + $0x8] sm:$0xf0] %v1388_v0  ;;  %99 = vst [vmem:[#allocation2 + $0x20] sm:$0xf0] %v1388_v0  ;;  %121 = vrot.lane.b32.xlu1 %v1247_v1, %s1389_s30  ;;  %v120_v3 = vcombine.high %v1247_v1, %v1247_v1  ;;  %104 = vrot.lane.b32.xlu0 %v101_v2, %s1389_s30  ;;  %v103_v4 = vcombine.high %v101_v2, %v101_v2  ;;  %vm115_vm4 = vcmask 134144   ;;  %s1390_s0 = smov 94  }
  0x1c   :  { %651 = vst.msk [vmem:[#allocation4] sm:$0xff] %vm88_vm0, %v1388_v0  ;;  %652 = vst.msk [vmem:[#allocation4 + $0x18] sm:$0xff] %vm88_vm0, %v1388_v0  ;;  %s1391_s6 = smov 95   ;;  %s1392_s7 = smov 96   ;;  %v1398_v17 = vmov 0   ;;  %v655_v18 = vld [vmem:[%s1887_s2] sm:$0xff] }
  0x1d   :  { %98 = vst [vmem:[#allocation2 + $0x18] sm:$0xf0] %v1388_v0  ;;  %94 = vst [vmem:[#allocation2] sm:$0xf0] %v1388_v0  ;;  %s1393_s8 = smov 110   ;;  %s1394_s9 = smov 111   ;;  %1316 = vset.pattern.permute.xlu0 %v1398_v17  ;;  %1317 = vset.pattern.permute.xlu1 %v1398_v17 }
  0x1e   :  { %93 = vst.msk [vmem:[#allocation2 + $0x28] sm:$0xff] %vm91_vm1, %v1388_v0  ;;  %92 = vst.msk [vmem:[#allocation2 + $0x10] sm:$0xff] %vm91_vm1, %v1388_v0  ;;  %s1395_s10 = smov 112   ;;  %s1396_s11 = smov 126   ;;  %v46_v26 = vand.u32 127, %v45_v23  ;;  %vm299_vm5 = vcmask 769024  }
  0x1f   :  { %653 = vst.msk [vmem:[#allocation4 + $0x10] sm:$0xff] %vm91_vm1, %v1388_v0  ;;  %654 = vst.msk [vmem:[#allocation4 + $0x28] sm:$0xff] %vm91_vm1, %v1388_v0  ;;  %123 = vrot.lane.b32.xlu1 %v120_v3, %s1389_s30  ;;  %106 = vrot.lane.b32.xlu0 %v103_v4, %s1389_s30  ;;  %s1397_s12 = smov 127   ;;  %vm280_vm8 = vcmask 777216   ;;  %vm259_vm9 = vcmask 785408   ;;  %vm238_vm12 = vcmask 900096  }
  0x20   :  { %100 = vst.msk [vmem:[#allocation2 + $0x28] sm:$0xf0] %vm96_vm2, %v1388_v0  ;;  %97 = vst.msk [vmem:[#allocation2 + $0x10] sm:$0xf0] %vm96_vm2, %v1388_v0  ;;  %v47_v29 = vadd.s32 128, %v46_v26  ;;  %v52_v35 = vand.u32 15, %v46_v26 }
  0x21   :  { %vm219_vm13 = vcmask 908288   ;;  %vm198_vm14 = vcmask 916480   ;;  %vm177_vm15 = vcmask 1031168   ;;  %vm154_vm1 = vcmask 1039360  }
  0x22   :  { %v59_v32 = vand.u32 15, %v47_v29  ;;  %v1577_v39 = vadd.s32 1, %v52_v35  ;;  %v1597_v55 = vadd.s32 4294967295, %v52_v35  ;;  %vm505_vm2 = vcmask 588800  }
  0x24   :  { %v1571_v36 = vadd.s32 1, %v59_v32  ;;  %vm84_vm7 = vcmp.lt.s32.totalorder %v1577_v39, 16  ;;  %v1595_v52 = vadd.s32 4294967295, %v59_v32  ;;  %vm74_vm11 = vcmp.ge.s32.totalorder %v1597_v55, 0 }
  0x26   :  { %vm85_vm6 = vcmp.lt.s32.totalorder %v1571_v36, 16  ;;  %vm75_vm10 = vcmp.ge.s32.totalorder %v1595_v52, 0 }
  0x8d   :  { %v122_v5 = vpop.permute.xlu1 %121  ;;  %v105_v6 = vpop.permute.xlu0 %104 }
  0x8e   :  { %129 = vst.msk [vmem:[#allocation2 + $0x18] sm:$0xf] %vm112_vm3, %v122_v5  ;;  %113 = vst.msk [vmem:[#allocation2] sm:$0xf] %vm112_vm3, %v105_v6  ;;  %vm675_vm3 = vcmask 1047688  }
  0x91   :  { %v124_v7 = vpop.permute.xlu1 %123  ;;  %v107_v8 = vpop.permute.xlu0 %106 }
  0x92   :  { %v125_v9 = vsel %vm88_vm0, %v122_v5, %v124_v7  ;;  %131 = vst.msk [vmem:[#allocation2 + $0x28] sm:$0xf] %vm115_vm4, %v124_v7  ;;  %v108_v10 = vsel %vm88_vm0, %v105_v6, %v107_v8  ;;  %116 = vst.msk [vmem:[#allocation2 + $0x10] sm:$0xf] %vm115_vm4, %v107_v8 }
  0x93   :  { %130 = vst [vmem:[#allocation2 + $0x20] sm:$0xf] %v125_v9  ;;  %114 = vst [vmem:[#allocation2 + $0x8] sm:$0xf] %v108_v10 }
  0x95   :  { %v1470_v11 = vld [vmem:[#allocation2 + $0x18] sm:$0xff]  ;;  %v1472_v12 = vld [vmem:[#allocation2] sm:$0xff] }
  0x96   :  { %454 = vrot.lane.b32.xlu1 %v1470_v11, %s1390_s0  ;;  %293 = vrot.lane.b32.xlu0 %v1472_v12, %s1390_s0 }
  0x99   :  { %v289_v13 = vld [vmem:[#allocation2 + $0x10] sm:$0xff]  ;;  %v450_v15 = vld [vmem:[#allocation2 + $0x28] sm:$0xff] }
  0x9a   :  { %436 = vrot.lane.b32.xlu1 %v1470_v11, %s1391_s6  ;;  %274 = vrot.lane.b32.xlu0 %v1472_v12, %s1391_s6  ;;  %v1502_v14 = vld [vmem:[#allocation2 + $0x8] sm:$0xff]  ;;  %v1507_v16 = vld [vmem:[#allocation2 + $0x20] sm:$0xff] }
  0x9e   :  { %416 = vrot.lane.b32.xlu1 %v1470_v11, %s1392_s7  ;;  %253 = vrot.lane.b32.xlu0 %v1472_v12, %s1392_s7 }
  0xa2   :  { %396 = vrot.lane.b32.xlu1 %v1470_v11, %s1393_s8  ;;  %232 = vrot.lane.b32.xlu0 %v1472_v12, %s1393_s8 }
  0xa6   :  { %378 = vrot.lane.b32.xlu1 %v1470_v11, %s1394_s9  ;;  %213 = vrot.lane.b32.xlu0 %v1472_v12, %s1394_s9 }
  0xaa   :  { %358 = vrot.lane.b32.xlu1 %v1470_v11, %s1395_s10  ;;  %192 = vrot.lane.b32.xlu0 %v1472_v12, %s1395_s10 }
  0xae   :  { %338 = vrot.lane.b32.xlu1 %v1470_v11, %s1396_s11  ;;  %171 = vrot.lane.b32.xlu0 %v1472_v12, %s1396_s11 }
  0xb2   :  { %297 = vrot.lane.b32.xlu1 %v289_v13, %s1390_s0  ;;  %295 = vrot.lane.b32.xlu0 %v1502_v14, %s1390_s0 }
  0xb6   :  { %458 = vrot.lane.b32.xlu1 %v450_v15, %s1390_s0  ;;  %456 = vrot.lane.b32.xlu0 %v1507_v16, %s1390_s0 }
  0xba   :  { %278 = vrot.lane.b32.xlu1 %v289_v13, %s1391_s6  ;;  %276 = vrot.lane.b32.xlu0 %v1502_v14, %s1391_s6 }
  0xbe   :  { %440 = vrot.lane.b32.xlu1 %v450_v15, %s1391_s6  ;;  %438 = vrot.lane.b32.xlu0 %v1507_v16, %s1391_s6 }
  0xc2   :  { %257 = vrot.lane.b32.xlu1 %v289_v13, %s1392_s7  ;;  %255 = vrot.lane.b32.xlu0 %v1502_v14, %s1392_s7 }
  0xc6   :  { %420 = vrot.lane.b32.xlu1 %v450_v15, %s1392_s7  ;;  %418 = vrot.lane.b32.xlu0 %v1507_v16, %s1392_s7 }
  0xca   :  { %236 = vrot.lane.b32.xlu1 %v289_v13, %s1393_s8  ;;  %234 = vrot.lane.b32.xlu0 %v1502_v14, %s1393_s8 }
  0xce   :  { %400 = vrot.lane.b32.xlu1 %v450_v15, %s1393_s8  ;;  %398 = vrot.lane.b32.xlu0 %v1507_v16, %s1393_s8 }
  0xd2   :  { %217 = vrot.lane.b32.xlu1 %v289_v13, %s1394_s9  ;;  %215 = vrot.lane.b32.xlu0 %v1502_v14, %s1394_s9 }
  0xd6   :  { %382 = vrot.lane.b32.xlu1 %v450_v15, %s1394_s9  ;;  %380 = vrot.lane.b32.xlu0 %v1507_v16, %s1394_s9 }
  0xda   :  { %196 = vrot.lane.b32.xlu1 %v289_v13, %s1395_s10  ;;  %194 = vrot.lane.b32.xlu0 %v1502_v14, %s1395_s10 }
  0xde   :  { %362 = vrot.lane.b32.xlu1 %v450_v15, %s1395_s10  ;;  %360 = vrot.lane.b32.xlu0 %v1507_v16, %s1395_s10 }
  0xe2   :  { %175 = vrot.lane.b32.xlu1 %v289_v13, %s1396_s11  ;;  %173 = vrot.lane.b32.xlu0 %v1502_v14, %s1396_s11 }
  0xe6   :  { %342 = vrot.lane.b32.xlu1 %v450_v15, %s1396_s11  ;;  %340 = vrot.lane.b32.xlu0 %v1507_v16, %s1396_s11 }
  0xea   :  { %152 = vrot.lane.b32.xlu1 %v289_v13, %s1397_s12  ;;  %150 = vrot.lane.b32.xlu0 %v1502_v14, %s1397_s12 }
  0xee   :  { %324 = vrot.lane.b32.xlu1 %v450_v15, %s1397_s12  ;;  %322 = vrot.lane.b32.xlu0 %v1507_v16, %s1397_s12 }
  0xf2   :  { %320 = vrot.lane.b32.xlu1 %v1470_v11, %s1397_s12  ;;  %148 = vrot.lane.b32.xlu0 %v1472_v12, %s1397_s12 }
  0xf6   :  { %658 = vperm.xlu0 %1316, %v655_v18   ;;  %682 = vperm.xlu1 %1317, %v655_v18  }
 0x108   :  { %v455_v19 = vpop.permute.xlu1 %454  ;;  %v294_v20 = vpop.permute.xlu0 %293 }
 0x10c   :  { %v437_v21 = vpop.permute.xlu1 %436  ;;  %v275_v22 = vpop.permute.xlu0 %274 }
 0x110   :  { %v417_v24 = vpop.permute.xlu1 %416  ;;  %v254_v25 = vpop.permute.xlu0 %253 }
 0x114   :  { %v1561_v27 = vpop.permute.xlu1 %396  ;;  %v233_v28 = vpop.permute.xlu0 %232 }
 0x118   :  { %v1563_v30 = vpop.permute.xlu1 %378  ;;  %v1565_v31 = vpop.permute.xlu0 %213 }
 0x11c   :  { %v1567_v33 = vpop.permute.xlu1 %358  ;;  %v1569_v34 = vpop.permute.xlu0 %192 }
 0x120   :  { %v1573_v37 = vpop.permute.xlu1 %338  ;;  %v1575_v38 = vpop.permute.xlu0 %171 }
 0x124   :  { %v298_v40 = vpop.permute.xlu1 %297  ;;  %v296_v41 = vpop.permute.xlu0 %295 }
 0x125   :  { %v301_v42 = vsel %vm299_vm5, %v296_v41, %v298_v40  ;;  %v300_v43 = vsel %vm299_vm5, %v294_v20, %v296_v41 }
 0x126   :  { %1252 = vmatprep.subr.msk.mxu0 %vm85_vm6, %v301_v42 }
 0x127   :  { %1253 = vmatpush1.msk.msra.mxu0 %vm84_vm7, %v300_v43 }
 0x128   :  { %v459_v44 = vpop.permute.xlu1 %458  ;;  %v457_v45 = vpop.permute.xlu0 %456 }
 0x129   :  { %v461_v46 = vsel %vm299_vm5, %v457_v45, %v459_v44  ;;  %v460_v47 = vsel %vm299_vm5, %v455_v19, %v457_v45 }
 0x12a   :  { %1264 = vmatprep.subr.msk.mxu1 %vm85_vm6, %v461_v46 }
 0x12b   :  { %1265 = vmatpush1.msk.msra.mxu1 %vm84_vm7, %v460_v47 }
 0x12c   :  { %v279_v48 = vpop.permute.xlu1 %278  ;;  %v277_v49 = vpop.permute.xlu0 %276 }
 0x12d   :  { %v282_v50 = vsel %vm280_vm8, %v277_v49, %v279_v48  ;;  %v281_v51 = vsel %vm280_vm8, %v275_v22, %v277_v49 }
 0x12e   :  { %525 = vmatprep.subr.mxu0 %v282_v50 }
 0x12f   :  { %526 = vmatpush1.msra.mxu0 %v281_v51  ;;  %v468_v51 = vld [vmem:[#allocation6] sm:$0xff] }
 0x130   :  { %v441_v53 = vpop.permute.xlu1 %440  ;;  %v439_v54 = vpop.permute.xlu0 %438 }
 0x131   :  { %v443_v56 = vsel %vm280_vm8, %v439_v54, %v441_v53  ;;  %v442_v57 = vsel %vm280_vm8, %v437_v21, %v439_v54 }
 0x132   :  { %596 = vmatprep.subr.mxu1 %v443_v56 }
 0x133   :  { %597 = vmatpush1.msra.mxu1 %v442_v57 }
 0x134   :  { %v258_v58 = vpop.permute.xlu1 %257  ;;  %v256_v59 = vpop.permute.xlu0 %255 }
 0x135   :  { %v260_v60 = vsel %vm259_vm9, %v254_v25, %v256_v59  ;;  %v261_v61 = vsel %vm259_vm9, %v256_v59, %v258_v58 }
 0x136   :  { %1254 = vmatprep.subr.msk.mxu0 %vm75_vm10, %v261_v61 }
 0x137   :  { %1255 = vmatpush1.msk.msra.mxu0 %vm74_vm11, %v260_v60 }
 0x138   :  { %v421_v62 = vpop.permute.xlu1 %420  ;;  %v419_v63 = vpop.permute.xlu0 %418 }
 0x139   :  { %v422_v1 = vsel %vm259_vm9, %v417_v24, %v419_v63  ;;  %v423_v2 = vsel %vm259_vm9, %v419_v63, %v421_v62 }
 0x13a   :  { %1266 = vmatprep.subr.msk.mxu1 %vm75_vm10, %v423_v2 }
 0x13b   :  { %1267 = vmatpush1.msk.msra.mxu1 %vm74_vm11, %v422_v1 }
 0x13c   :  { %v237_v3 = vpop.permute.xlu1 %236  ;;  %v235_v4 = vpop.permute.xlu0 %234 }
 0x13d   :  { %v239_v5 = vsel %vm238_vm12, %v233_v28, %v235_v4  ;;  %v240_v6 = vsel %vm238_vm12, %v235_v4, %v237_v3 }
 0x13e   :  { %1256 = vmatprep.subr.msk.mxu0 %vm85_vm6, %v240_v6 }
 0x13f   :  { %1257 = vmatpush1.msk.msra.mxu0 %vm84_vm7, %v239_v5 }
 0x140   :  { %v401_v7 = vpop.permute.xlu1 %400  ;;  %v399_v8 = vpop.permute.xlu0 %398 }
 0x141   :  { %v402_v9 = vsel %vm238_vm12, %v1561_v27, %v399_v8  ;;  %v403_v10 = vsel %vm238_vm12, %v399_v8, %v401_v7 }
 0x142   :  { %1268 = vmatprep.subr.msk.mxu1 %vm85_vm6, %v403_v10  ;;  %v1204_v10 = vld [vmem:[%s1889_s4] sm:$0xff]  ;;  %s1399_s4 = smov [#allocation11]  }
 0x143   :  { %1269 = vmatpush1.msk.msra.mxu1 %vm84_vm7, %v402_v9  ;;  %s1234_s16 = sshll.u32 %s1399_s4, 4  ;;  %s1235_s16 = int_to_ptr.vmem [resolvable:$true] %s1234_s16 }
 0x144   :  { %v218_v13 = vpop.permute.xlu1 %217  ;;  %v216_v15 = vpop.permute.xlu0 %215  ;;  %s1360_s17 = scalar_lea.vmem %s1235_s16, 512  ;;  %p1365_p11 = scmp.lt.s32.totalorder %s1235_s16, %s1235_s16 }
 0x145   :  { %v221_v17 = vsel %vm219_vm13, %v216_v15, %v218_v13  ;;  %v220_v18 = vsel %vm219_vm13, %v1565_v31, %v216_v15  ;;  %p1361_p10 = scmp.ne.s32.totalorder %s1235_s16, %s1360_s17  ;;  %p1366_p12 = scmp.lt.s32.totalorder %s1360_s17, %s1360_s17 }
 0x146   :  { %531 = vmatprep.subr.mxu0 %v221_v17 }
 0x147   :  { %532 = vmatpush1.msra.mxu0 %v220_v18  ;;  %p1367_p13 = por %p1366_p12, %p1365_p11 }
 0x148   :  { %v383_v19 = vpop.permute.xlu1 %382  ;;  %v381_v20 = vpop.permute.xlu0 %380 }
 0x149   :  { %v385_v21 = vsel %vm219_vm13, %v381_v20, %v383_v19  ;;  %v384_v22 = vsel %vm219_vm13, %v1563_v30, %v381_v20  ;;  %p1368_p0 = pnand %p1367_p13, %p1361_p10 }
 0x14a   :  { %602 = vmatprep.subr.mxu1 %v385_v21 }
 0x14b   :  { %603 = vmatpush1.msra.mxu1 %v384_v22 }
 0x14c   :  { %v197_v23 = vpop.permute.xlu1 %196  ;;  %v195_v24 = vpop.permute.xlu0 %194 }
 0x14d   :  { %v199_v25 = vsel %vm198_vm14, %v1569_v34, %v195_v24  ;;  %v200_v26 = vsel %vm198_vm14, %v195_v24, %v197_v23 }
 0x14e   :  { %1258 = vmatprep.subr.msk.mxu0 %vm75_vm10, %v200_v26 }
 0x14f   :  { %1259 = vmatpush1.msk.msra.mxu0 %vm74_vm11, %v199_v25 }
 0x150   :  { %v363_v27 = vpop.permute.xlu1 %362  ;;  %v361_v28 = vpop.permute.xlu0 %360 }
 0x151   :  { %v364_v29 = vsel %vm198_vm14, %v1567_v33, %v361_v28  ;;  %v365_v30 = vsel %vm198_vm14, %v361_v28, %v363_v27 }
 0x152   :  { %1270 = vmatprep.subr.msk.mxu1 %vm75_vm10, %v365_v30 }
 0x153   :  { %1271 = vmatpush1.msk.msra.mxu1 %vm74_vm11, %v364_v29 }
 0x154   :  { %v176_v31 = vpop.permute.xlu1 %175  ;;  %v174_v32 = vpop.permute.xlu0 %173 }
 0x155   :  { %v178_v34 = vsel %vm177_vm15, %v1575_v38, %v174_v32  ;;  %v179_v35 = vsel %vm177_vm15, %v174_v32, %v176_v31 }
 0x156   :  { %1260 = vmatprep.subr.msk.mxu0 %vm85_vm6, %v179_v35 }
 0x157   :  { %1261 = vmatpush1.msk.msra.mxu0 %vm84_vm7, %v178_v34 }
 0x158   :  { %v343_v33 = vpop.permute.xlu1 %342  ;;  %v341_v40 = vpop.permute.xlu0 %340 }
 0x159   :  { %v344_v41 = vsel %vm177_vm15, %v1573_v37, %v341_v40  ;;  %v345_v42 = vsel %vm177_vm15, %v341_v40, %v343_v33 }
 0x15a   :  { %1272 = vmatprep.subr.msk.mxu1 %vm85_vm6, %v345_v42 }
 0x15b   :  { %1273 = vmatpush1.msk.msra.mxu1 %vm84_vm7, %v344_v41 }
 0x15c   :  { %v153_v38 = vpop.permute.xlu1 %152  ;;  %v151_v43 = vpop.permute.xlu0 %150 }
 0x15d   :  { %v156_v44 = vsel %vm154_vm1, %v151_v43, %v153_v38 }
 0x15e   :  { %537 = vmatprep.subr.mxu0 %v156_v44 }
 0x160   :  { %v325_v45 = vpop.permute.xlu1 %324  ;;  %v323_v46 = vpop.permute.xlu0 %322 }
 0x161   :  { %v327_v47 = vsel %vm154_vm1, %v323_v46, %v325_v45 }
 0x162   :  { %608 = vmatprep.subr.mxu1 %v327_v47 }
 0x164   :  { %v321_v37 = vpop.permute.xlu1 %320  ;;  %v149_v48 = vpop.permute.xlu0 %148 }
 0x165   :  { %v155_v49 = vsel %vm154_vm1, %v149_v48, %v151_v43  ;;  %v326_v50 = vsel %vm154_vm1, %v321_v37, %v323_v46 }
 0x166   :  { %538 = vmatpush1.msra.mxu0 %v155_v49  ;;  %609 = vmatpush1.msra.mxu1 %v326_v50 }
 0x167   :  { %1262 = vmatprep.subr.msk.mxu0 %vm75_vm10, %v1502_v14  ;;  %1274 = vmatprep.subr.msk.mxu1 %vm75_vm10, %v1507_v16 }
 0x168   :  { %1263 = vmatpush1.msk.msra.mxu0 %vm74_vm11, %v1472_v12  ;;  %1275 = vmatpush1.msk.msra.mxu1 %vm74_vm11, %v1470_v11 }
 0x169   :  { %1248 = vmatmul.mubr.msk.f32.vlgmr.msra.gmra.mxu0 %vm505_vm2, %v468_v51  ;;  %1249 = vmatmul.mubr.msk.f32.vlgmr.msra.gmra.mxu1 %vm505_vm2, %v468_v51 }
 0x16a   :  { %1126 = vmatprep.mubr.f32.mxu0 %v1388_v0  ;;  %1197 = vmatprep.mubr.f32.mxu1 %v1388_v0 }
 0x171   :  { %v659_v14 = vpop.permute.xlu0 %658  ;;  %v683_v53 = vpop.permute.xlu1 %682 }
 0x229   :  { %v575_v54 = vpop.f32.mrf.mxu0  ;;  %v646_v16 = vpop.f32.mrf.mxu1 }
 0x22a   :  { %v661_v56 = vadd.f32 %v659_v14, %v575_v54  ;;  %v685_v57 = vadd.f32 %v683_v53, %v646_v16 }
 0x22b   :  { %v577_v58 = vpop.f32.mrf.mxu0  ;;  %v648_v12 = vpop.f32.mrf.mxu1 }
 0x22c   :  { %v663_v59 = vmax.f32 %v661_v56, 0.0  ;;  %v662_v60 = vadd.f32 %v659_v14, %v577_v58  ;;  %v687_v11 = vmax.f32 %v685_v57, 0.0  ;;  %v686_v62 = vadd.f32 %v683_v53, %v648_v12 }
 0x22e   :  { %v664_v61 = vmax.f32 %v662_v60, 0.0  ;;  %667 = vrot.lane.b32.xlu1 %v663_v59, %s1389_s30  ;;  %v688_v63 = vmax.f32 %v686_v62, 0.0 }
 0x230   :  { %669 = vrot.lane.b32.xlu0 %v664_v61, %s1389_s30 }
 0x232   :  { %691 = vrot.lane.b32.xlu1 %v687_v11, %s1389_s30 }
 0x234   :  { %693 = vrot.lane.b32.xlu0 %v688_v63, %s1389_s30 }
 0x2a0   :  { %v668_v0 = vpop.permute.xlu1 %667 }
 0x2a1   :  { %676 = vst.msk [vmem:[#allocation4] sm:$0xff] %vm675_vm3, %v668_v0 }
 0x2a2   :  { %v670_v1 = vpop.permute.xlu0 %669 }
 0x2a3   :  { %v1687_v2 = vsel %vm88_vm0, %v668_v0, %v670_v1  ;;  %678 = vst.msk [vmem:[#allocation4 + $0x10] sm:$0xff] %vm88_vm0, %v670_v1 }
 0x2a4   :  { %v692_v3 = vpop.permute.xlu1 %691 }
 0x2a5   :  { %699 = vst.msk [vmem:[#allocation4 + $0x18] sm:$0xff] %vm675_vm3, %v692_v3 }
 0x2a6   :  { %v694_v4 = vpop.permute.xlu0 %693 }
 0x2a7   :  { %v1691_v5 = vsel %vm88_vm0, %v692_v3, %v694_v4  ;;  %701 = vst.msk [vmem:[#allocation4 + $0x28] sm:$0xff] %vm88_vm0, %v694_v4 }
 0x2a8   :  { %v1694_v6 = vld [vmem:[#allocation4] sm:$0xff] }
 0x2a9   :  { %848 = vrot.lane.b32.xlu1 %v1694_v6, %s1390_s0 }
 0x2aa   :  { %v844_v8 = vld [vmem:[#allocation4 + $0x10] sm:$0xff] }
 0x2ac   :  { %v1698_v7 = vld [vmem:[#allocation4 + $0x18] sm:$0xff] }
 0x2ad   :  { %830 = vrot.lane.b32.xlu1 %v1694_v6, %s1391_s6  ;;  %1008 = vrot.lane.b32.xlu0 %v1698_v7, %s1390_s0 }
 0x2ae   :  { %v1004_v9 = vld [vmem:[#allocation4 + $0x28] sm:$0xff] }
 0x2b1   :  { %810 = vrot.lane.b32.xlu1 %v1694_v6, %s1392_s7  ;;  %990 = vrot.lane.b32.xlu0 %v1698_v7, %s1391_s6 }
 0x2b5   :  { %790 = vrot.lane.b32.xlu1 %v1694_v6, %s1393_s8  ;;  %970 = vrot.lane.b32.xlu0 %v1698_v7, %s1392_s7 }
 0x2b9   :  { %772 = vrot.lane.b32.xlu1 %v1694_v6, %s1394_s9  ;;  %950 = vrot.lane.b32.xlu0 %v1698_v7, %s1393_s8 }
 0x2bd   :  { %752 = vrot.lane.b32.xlu1 %v1694_v6, %s1395_s10  ;;  %932 = vrot.lane.b32.xlu0 %v1698_v7, %s1394_s9 }
 0x2c1   :  { %732 = vrot.lane.b32.xlu1 %v1694_v6, %s1396_s11  ;;  %912 = vrot.lane.b32.xlu0 %v1698_v7, %s1395_s10 }
 0x2c5   :  { %892 = vrot.lane.b32.xlu0 %v1698_v7, %s1396_s11  ;;  %850 = vrot.lane.b32.xlu1 %v1687_v2, %s1390_s0 }
 0x2c9   :  { %852 = vrot.lane.b32.xlu0 %v844_v8, %s1390_s0  ;;  %1010 = vrot.lane.b32.xlu1 %v1691_v5, %s1390_s0 }
 0x2cd   :  { %1012 = vrot.lane.b32.xlu0 %v1004_v9, %s1390_s0  ;;  %832 = vrot.lane.b32.xlu1 %v1687_v2, %s1391_s6 }
 0x2d1   :  { %834 = vrot.lane.b32.xlu0 %v844_v8, %s1391_s6  ;;  %992 = vrot.lane.b32.xlu1 %v1691_v5, %s1391_s6 }
 0x2d5   :  { %994 = vrot.lane.b32.xlu0 %v1004_v9, %s1391_s6  ;;  %812 = vrot.lane.b32.xlu1 %v1687_v2, %s1392_s7 }
 0x2d9   :  { %814 = vrot.lane.b32.xlu0 %v844_v8, %s1392_s7  ;;  %972 = vrot.lane.b32.xlu1 %v1691_v5, %s1392_s7 }
 0x2dd   :  { %974 = vrot.lane.b32.xlu0 %v1004_v9, %s1392_s7  ;;  %792 = vrot.lane.b32.xlu1 %v1687_v2, %s1393_s8 }
 0x2e1   :  { %794 = vrot.lane.b32.xlu0 %v844_v8, %s1393_s8  ;;  %952 = vrot.lane.b32.xlu1 %v1691_v5, %s1393_s8 }
 0x2e5   :  { %954 = vrot.lane.b32.xlu0 %v1004_v9, %s1393_s8  ;;  %774 = vrot.lane.b32.xlu1 %v1687_v2, %s1394_s9 }
 0x2e9   :  { %776 = vrot.lane.b32.xlu0 %v844_v8, %s1394_s9  ;;  %934 = vrot.lane.b32.xlu1 %v1691_v5, %s1394_s9 }
 0x2ed   :  { %936 = vrot.lane.b32.xlu0 %v1004_v9, %s1394_s9  ;;  %754 = vrot.lane.b32.xlu1 %v1687_v2, %s1395_s10 }
 0x2f1   :  { %756 = vrot.lane.b32.xlu0 %v844_v8, %s1395_s10  ;;  %914 = vrot.lane.b32.xlu1 %v1691_v5, %s1395_s10 }
 0x2f5   :  { %916 = vrot.lane.b32.xlu0 %v1004_v9, %s1395_s10  ;;  %734 = vrot.lane.b32.xlu1 %v1687_v2, %s1396_s11 }
 0x2f9   :  { %736 = vrot.lane.b32.xlu0 %v844_v8, %s1396_s11  ;;  %894 = vrot.lane.b32.xlu1 %v1691_v5, %s1396_s11 }
 0x2fd   :  { %896 = vrot.lane.b32.xlu0 %v1004_v9, %s1396_s11  ;;  %716 = vrot.lane.b32.xlu1 %v1687_v2, %s1397_s12 }
 0x301   :  { %718 = vrot.lane.b32.xlu0 %v844_v8, %s1397_s12  ;;  %876 = vrot.lane.b32.xlu1 %v1691_v5, %s1397_s12 }
 0x305   :  { %878 = vrot.lane.b32.xlu0 %v1004_v9, %s1397_s12  ;;  %714 = vrot.lane.b32.xlu1 %v1694_v6, %s1397_s12 }
 0x309   :  { %874 = vrot.lane.b32.xlu0 %v1698_v7, %s1397_s12  ;;  %1207 = vperm.xlu1 %1317, %v1204_v10  }
 0x30d   :  { %1219 = vperm.xlu0 %1316, %v1204_v10  }
 0x31b   :  { %v849_v13 = vpop.permute.xlu1 %848 }
 0x31f   :  { %v831_v15 = vpop.permute.xlu1 %830  ;;  %v1009_v17 = vpop.permute.xlu0 %1008 }
 0x323   :  { %v811_v18 = vpop.permute.xlu1 %810  ;;  %v991_v19 = vpop.permute.xlu0 %990 }
 0x327   :  { %v791_v20 = vpop.permute.xlu1 %790  ;;  %v971_v21 = vpop.permute.xlu0 %970 }
 0x32b   :  { %v773_v22 = vpop.permute.xlu1 %772  ;;  %v951_v23 = vpop.permute.xlu0 %950 }
 0x32f   :  { %v1781_v24 = vpop.permute.xlu1 %752  ;;  %v1783_v25 = vpop.permute.xlu0 %932 }
 0x333   :  { %v1785_v26 = vpop.permute.xlu1 %732  ;;  %v1787_v27 = vpop.permute.xlu0 %912 }
 0x337   :  { %v851_v28 = vpop.permute.xlu1 %850  ;;  %v1789_v29 = vpop.permute.xlu0 %892 }
 0x338   :  { %v854_v34 = vsel %vm299_vm5, %v849_v13, %v851_v28 }
 0x33b   :  { %v1011_v30 = vpop.permute.xlu1 %1010  ;;  %v853_v31 = vpop.permute.xlu0 %852 }
 0x33c   :  { %v855_v32 = vsel %vm299_vm5, %v851_v28, %v853_v31  ;;  %v1014_v41 = vsel %vm299_vm5, %v1009_v17, %v1011_v30 }
 0x33d   :  { %1276 = vmatprep.subr.msk.mxu0 %vm85_vm6, %v855_v32 }
 0x33e   :  { %1277 = vmatpush1.msk.msra.mxu0 %vm84_vm7, %v854_v34 }
 0x33f   :  { %v833_v35 = vpop.permute.xlu1 %832  ;;  %v1013_v33 = vpop.permute.xlu0 %1012 }
 0x340   :  { %v1015_v40 = vsel %vm299_vm5, %v1011_v30, %v1013_v33  ;;  %v836_v44 = vsel %vm280_vm8, %v831_v15, %v833_v35 }
 0x341   :  { %1288 = vmatprep.subr.msk.mxu1 %vm85_vm6, %v1015_v40 }
 0x342   :  { %1289 = vmatpush1.msk.msra.mxu1 %vm84_vm7, %v1014_v41 }
 0x343   :  { %v993_v42 = vpop.permute.xlu1 %992  ;;  %v835_v38 = vpop.permute.xlu0 %834 }
 0x344   :  { %v837_v43 = vsel %vm280_vm8, %v833_v35, %v835_v38  ;;  %v996_v37 = vsel %vm280_vm8, %v991_v19, %v993_v42 }
 0x345   :  { %1078 = vmatprep.subr.mxu0 %v837_v43 }
 0x346   :  { %1079 = vmatpush1.msra.mxu0 %v836_v44 }
 0x347   :  { %v813_v45 = vpop.permute.xlu1 %812  ;;  %v995_v46 = vpop.permute.xlu0 %994 }
 0x348   :  { %v997_v47 = vsel %vm280_vm8, %v993_v42, %v995_v46  ;;  %v816_v51 = vsel %vm259_vm9, %v811_v18, %v813_v45 }
 0x349   :  { %1149 = vmatprep.subr.mxu1 %v997_v47 }
 0x34a   :  { %1150 = vmatpush1.msra.mxu1 %v996_v37 }
 0x34b   :  { %v973_v48 = vpop.permute.xlu1 %972  ;;  %v815_v49 = vpop.permute.xlu0 %814 }
 0x34c   :  { %v817_v50 = vsel %vm259_vm9, %v813_v45, %v815_v49  ;;  %v976_v16 = vsel %vm259_vm9, %v971_v21, %v973_v48 }
 0x34d   :  { %1278 = vmatprep.subr.msk.mxu0 %vm75_vm10, %v817_v50 }
 0x34e   :  { %1279 = vmatpush1.msk.msra.mxu0 %vm74_vm11, %v816_v51 }
 0x34f   :  { %v793_v14 = vpop.permute.xlu1 %792  ;;  %v975_v53 = vpop.permute.xlu0 %974 }
 0x350   :  { %v977_v54 = vsel %vm259_vm9, %v973_v48, %v975_v53  ;;  %v796_v12 = vsel %vm238_vm12, %v791_v20, %v793_v14 }
 0x351   :  { %1290 = vmatprep.subr.msk.mxu1 %vm75_vm10, %v977_v54 }
 0x352   :  { %1291 = vmatpush1.msk.msra.mxu1 %vm74_vm11, %v976_v16 }
 0x353   :  { %v953_v56 = vpop.permute.xlu1 %952  ;;  %v795_v57 = vpop.permute.xlu0 %794 }
 0x354   :  { %v797_v58 = vsel %vm238_vm12, %v793_v14, %v795_v57  ;;  %v956_v11 = vsel %vm238_vm12, %v951_v23, %v953_v56 }
 0x355   :  { %1280 = vmatprep.subr.msk.mxu0 %vm85_vm6, %v797_v58 }
 0x356   :  { %1281 = vmatpush1.msk.msra.mxu0 %vm84_vm7, %v796_v12 }
 0x357   :  { %v775_v59 = vpop.permute.xlu1 %774  ;;  %v955_v60 = vpop.permute.xlu0 %954 }
 0x358   :  { %v957_v61 = vsel %vm238_vm12, %v953_v56, %v955_v60  ;;  %v778_v1 = vsel %vm219_vm13, %v773_v22, %v775_v59 }
 0x359   :  { %1292 = vmatprep.subr.msk.mxu1 %vm85_vm6, %v957_v61 }
 0x35a   :  { %1293 = vmatpush1.msk.msra.mxu1 %vm84_vm7, %v956_v11 }
 0x35b   :  { %v935_v62 = vpop.permute.xlu1 %934  ;;  %v777_v63 = vpop.permute.xlu0 %776 }
 0x35c   :  { %v779_v0 = vsel %vm219_vm13, %v775_v59, %v777_v63  ;;  %v938_v9 = vsel %vm219_vm13, %v1783_v25, %v935_v62 }
 0x35d   :  { %1084 = vmatprep.subr.mxu0 %v779_v0 }
 0x35e   :  { %1085 = vmatpush1.msra.mxu0 %v778_v1 }
 0x35f   :  { %v755_v3 = vpop.permute.xlu1 %754  ;;  %v937_v4 = vpop.permute.xlu0 %936 }
 0x360   :  { %v939_v8 = vsel %vm219_vm13, %v935_v62, %v937_v4  ;;  %v758_v17 = vsel %vm198_vm14, %v1781_v24, %v755_v3 }
 0x361   :  { %1155 = vmatprep.subr.mxu1 %v939_v8 }
 0x362   :  { %1156 = vmatpush1.msra.mxu1 %v938_v9 }
 0x363   :  { %v915_v10 = vpop.permute.xlu1 %914  ;;  %v757_v13 = vpop.permute.xlu0 %756 }
 0x364   :  { %v759_v15 = vsel %vm198_vm14, %v755_v3, %v757_v13  ;;  %v918_v21 = vsel %vm198_vm14, %v1787_v27, %v915_v10 }
 0x365   :  { %1282 = vmatprep.subr.msk.mxu0 %vm75_vm10, %v759_v15 }
 0x366   :  { %1283 = vmatpush1.msk.msra.mxu0 %vm74_vm11, %v758_v17 }
 0x367   :  { %v735_v18 = vpop.permute.xlu1 %734  ;;  %v917_v19 = vpop.permute.xlu0 %916 }
 0x368   :  { %v919_v20 = vsel %vm198_vm14, %v915_v10, %v917_v19  ;;  %v738_v25 = vsel %vm177_vm15, %v1785_v26, %v735_v18 }
 0x369   :  { %1294 = vmatprep.subr.msk.mxu1 %vm75_vm10, %v919_v20 }
 0x36a   :  { %1295 = vmatpush1.msk.msra.mxu1 %vm74_vm11, %v918_v21 }
 0x36b   :  { %v895_v22 = vpop.permute.xlu1 %894  ;;  %v737_v23 = vpop.permute.xlu0 %736 }
 0x36c   :  { %v739_v24 = vsel %vm177_vm15, %v735_v18, %v737_v23  ;;  %v898_v31 = vsel %vm177_vm15, %v1789_v29, %v895_v22  ;;  %v1022_v29 = vld [vmem:[#allocation9] sm:$0xff] }
 0x36d   :  { %1284 = vmatprep.subr.msk.mxu0 %vm85_vm6, %v739_v24 }
 0x36e   :  { %1285 = vmatpush1.msk.msra.mxu0 %vm84_vm7, %v738_v25 }
 0x36f   :  { %v717_v27 = vpop.permute.xlu1 %716  ;;  %v897_v28 = vpop.permute.xlu0 %896 }
 0x370   :  { %v899_v30 = vsel %vm177_vm15, %v895_v22, %v897_v28 }
 0x371   :  { %1296 = vmatprep.subr.msk.mxu1 %vm85_vm6, %v899_v30 }
 0x372   :  { %1297 = vmatpush1.msk.msra.mxu1 %vm84_vm7, %v898_v31 }
 0x373   :  { %v877_v26 = vpop.permute.xlu1 %876  ;;  %v719_v32 = vpop.permute.xlu0 %718 }
 0x374   :  { %v721_v34 = vsel %vm154_vm1, %v717_v27, %v719_v32 }
 0x375   :  { %1090 = vmatprep.subr.mxu0 %v721_v34 }
 0x377   :  { %v715_v35 = vpop.permute.xlu1 %714  ;;  %v879_v33 = vpop.permute.xlu0 %878 }
 0x378   :  { %v720_v40 = vsel %vm154_vm1, %v715_v35, %v717_v27  ;;  %v881_v41 = vsel %vm154_vm1, %v877_v26, %v879_v33 }
 0x379   :  { %1091 = vmatpush1.msra.mxu0 %v720_v40  ;;  %1161 = vmatprep.subr.mxu1 %v881_v41 }
 0x37a   :  { %1286 = vmatprep.subr.msk.mxu0 %vm75_vm10, %v1687_v2 }
 0x37b   :  { %1287 = vmatpush1.msk.msra.mxu0 %vm74_vm11, %v1694_v6  ;;  %v875_v36 = vpop.permute.xlu0 %874 }
 0x37c   :  { %v880_v39 = vsel %vm154_vm1, %v875_v36, %v877_v26  ;;  %1250 = vmatmul.mubr.msk.f32.vlgmr.msra.gmra.mxu0 %vm505_vm2, %v1022_v29 }
 0x37d   :  { %1162 = vmatpush1.msra.mxu1 %v880_v39 }
 0x37e   :  { %1298 = vmatprep.subr.msk.mxu1 %vm75_vm10, %v1691_v5 }
 0x37f   :  { %1299 = vmatpush1.msk.msra.mxu1 %vm74_vm11, %v1698_v7 }
 0x380   :  { %1251 = vmatmul.mubr.msk.f32.vlgmr.msra.gmra.mxu1 %vm505_vm2, %v1022_v29 }
 0x384   :  { %v1208_v2 = vpop.permute.xlu1 %1207 }
 0x388   :  { %v1220_v45 = vpop.permute.xlu0 %1219 }
 0x43c   :  { %v1128_v42 = vpop.f32.mrf.mxu0 }
 0x43d   :  { %v1210_v38 = vadd.f32 %v1208_v2, %v1128_v42 }
 0x43e   :  { %v1130_v6 = vpop.f32.mrf.mxu0 }
 0x43f   :  { %v1212_v43 = vmax.f32 %v1210_v38, 0.0  ;;  %v1211_v44 = vadd.f32 %v1208_v2, %v1130_v6 }
 0x440   :  { %v1199_v46 = vpop.f32.mrf.mxu1 }
 0x441   :  { %1214 = vst [vmem:[#allocation11] sm:$0xff] %v1212_v43  ;;  %v1213_v47 = vmax.f32 %v1211_v44, 0.0  ;;  %v1222_v37 = vadd.f32 %v1220_v45, %v1199_v46 }
 0x442   :  { %v1201_v52 = vpop.f32.mrf.mxu1 }
 0x443   :  { %1215 = vst [vmem:[#allocation11 + $0x8] sm:$0xff] %v1213_v47  ;;  %v1224_v5 = vmax.f32 %v1222_v37, 0.0  ;;  %v1223_v55 = vadd.f32 %v1220_v45, %v1201_v52 }
 0x445   :  { %1227 = vst [vmem:[#allocation11 + $0x10] sm:$0xff] %v1224_v5  ;;  %v1225_v7 = vmax.f32 %v1223_v55, 0.0 }
 0x447   :  { %1228 = vst [vmem:[#allocation11 + $0x18] sm:$0xff] %v1225_v7 }
 0x448   :  { %1371 = shalt.err (!%p1368_p0)
}
 0x449   :  { %s1400_s18 = smov 256   ;;  %s1401_s19 = smov 16  }
 0x44a   :  { %1240 = dma.vmem_to_hbm [thread:$0]  %s1235_s16, 512, %s1890_s5, [#allocation8], %s1400_s18, %s1400_s18, %s1401_s19  }
 0x44b   :  { %1384 = dma.done.wait [#allocation8], 512  }
 0x44c   :  { %1385 = vsyncadd [#allocation8], 4294966784 }
 0x44d   :  { %1244 = vsyncpa [#allocation7], 1 }
 0x44e   :  { %1245 = vsyncpa [#allocation10], 1 }
 0x44f   :  { %1246 = vsyncpa [#allocation8], 1 }

</bundles_post_ra>
